<compile_context>
chip_gen: v7x
topology: tpu7x:2x2x1
jax: 0.10.0
libtpu: 0.0.40
codegen_flags: <defaults>
</compile_context>

<pallas_src>
import functools

import jax
import jax.numpy as jnp
from jax import lax
from jax.experimental import pallas as pl
from jax.experimental.pallas import tpu as pltpu


def _round_up(x, m):
    return (x + m - 1) // m * m


# ------------------------- fused conv-stack kernel -------------------------

def _fused_conv_kernel(xc_ref, xp_ref, xn_ref, *args, K, n_layers, T_tile,
                       T_true, compute_dtype):
    """One (batch, time-tile) step of the fused Conv1d+BN+ReLU stack.

    xc_ref: (1, Cin, T_tile)      current time tile of x.
    xp_ref / xn_ref: (1, Cin, 128) neighbor strips supplying the halo columns.
    args: [w_0, b_0, ..., w_{L-1}, b_{L-1}, o_ref, xw_scratch]
      w_l: (Cout_l, K*Cin_l) BN-folded im2col taps; b_l: (Cout_l, 1) f32 bias.
    o_ref: (1, Cout_last, T_tile); xw_scratch: (Cin, T_tile + 2*halo).
    """
    pad = K // 2
    halo = n_layers * pad
    o_ref = args[2 * n_layers]
    xw_ref = args[2 * n_layers + 1]
    j = pl.program_id(1)

    # Assemble the haloed input window in VMEM scratch; halo columns come from
    # the 128-wide neighbor strips.  Out-of-range columns (sequence edges,
    # clamped strips, padded tail) are zeroed by the position mask below.
    if halo > 0:
        xw_ref[:, :halo] = xp_ref[0, :, 128 - halo:]
        xw_ref[:, halo:halo + T_tile] = xc_ref[0]
        xw_ref[:, halo + T_tile:] = xn_ref[0, :, :halo]
    else:
        xw_ref[...] = xc_ref[0]

    ext = T_tile + 2 * halo
    start = j * T_tile - halo            # global time index of window column 0

    def in_range_mask(col0, length):
        p = col0 + lax.broadcasted_iota(jnp.int32, (1, length), 1)
        return (p >= 0) & (p < T_true)

    # Layer-0 input: x zero-padded outside [0, T)  (== PyTorch 'same' padding).
    h = jnp.where(in_range_mask(start, ext),
                  xw_ref[...], 0.0).astype(compute_dtype)

    for li in range(n_layers):
        w_ref = args[2 * li]                         # (Cout, K*Cin_prev)
        b_ref = args[2 * li + 1]                     # (Cout, 1) f32
        out_len = ext - 2 * pad
        # im2col: stack the K shifted views along channels -> ONE deep matmul
        # (contraction depth K*Cin instead of Cin).
        if K > 1:
            h_cat = jnp.concatenate([h[:, k:k + out_len] for k in range(K)],
                                    axis=0)          # (K*Cin_prev, out_len)
        else:
            h_cat = h
        acc = jnp.dot(w_ref[...], h_cat, preferred_element_type=jnp.float32)
        act = jnp.maximum(acc + b_ref[...], 0.0)     # f32 bias + ReLU epilogue
        start = start + pad
        ext = out_len
        if li < n_layers - 1:
            # The next layer's 'same' padding must see zeros of THIS layer's
            # output outside [0, T) — mask before feeding it forward.
            act = jnp.where(in_range_mask(start, ext), act, 0.0)
        h = act.astype(compute_dtype)

    o_ref[0] = h.astype(o_ref.dtype)                 # lane-dense store


def fused_conv_bn_relu_stack(x, layers, *, kernel_size, T_tile=1024,
                             compute_dtype=jnp.float32):
    """x: (B, Cin, T); layers: [(w_taps (K,Cout,Cin_prev), bias (Cout,)), ...].

    Returns (B, Cout_last, T_r) activations in PyTorch channels-first layout,
    T_r = T rounded up to the time tile.  Columns in [T, T_r) are NOT valid
    conv outputs; they are neutralized downstream by zero-padded FC weights.
    """
    if kernel_size % 2 != 1:
        raise ValueError("padding=K//2 only matches PyTorch 'same' for odd K")
    B, Cin, T = x.shape
    K = kernel_size
    n_layers = len(layers)
    halo = n_layers * (K // 2)
    if halo > 128:
        raise ValueError("halo does not fit in one 128-column neighbor strip")

    T_tile = _round_up(min(T_tile, _round_up(T, 128)), 128)
    T_r = _round_up(T, T_tile)
    nT = T_r // T_tile
    S = T_tile // 128            # time tile measured in 128-column blocks
    n128 = T_r // 128            # whole (padded) sequence in 128-column blocks
    if T_r != T:
        x = jnp.pad(x, ((0, 0), (0, 0), (0, T_r - T)))
    x = x.astype(compute_dtype)

    c_last = layers[-1][0].shape[1]

    in_specs = [
        # current time tile
        pl.BlockSpec((1, Cin, T_tile), lambda b, j: (b, 0, j)),
        # 128-column neighbor strips for the halo (clamped at the sequence
        # edges; the in-kernel position mask zeroes anything outside [0, T)).
        pl.BlockSpec((1, Cin, 128),
                     lambda b, j: (b, 0, jnp.maximum(j * S - 1, 0))),
        pl.BlockSpec((1, Cin, 128),
                     lambda b, j: (b, 0, jnp.minimum(j * S + S, n128 - 1))),
    ]
    flat_args = []
    for w_taps, bias in layers:
        kk, co, ci = w_taps.shape
        # (K, Cout, Cin) -> (Cout, K*Cin): matches the in-kernel im2col stack.
        w_mat = jnp.transpose(w_taps, (1, 0, 2)).reshape(co, kk * ci)
        flat_args.append(w_mat.astype(compute_dtype))
        flat_args.append(bias.reshape(co, 1).astype(jnp.float32))
        in_specs.append(pl.BlockSpec((co, kk * ci), lambda b, j: (0, 0)))
        in_specs.append(pl.BlockSpec((co, 1), lambda b, j: (0, 0)))

    kern = functools.partial(_fused_conv_kernel, K=K, n_layers=n_layers,
                             T_tile=T_tile, T_true=T,
                             compute_dtype=compute_dtype)
    return pl.pallas_call(
        kern,
        out_shape=jax.ShapeDtypeStruct((B, c_last, T_r), compute_dtype),
        grid=(B, nT),
        in_specs=in_specs,
        out_specs=pl.BlockSpec((1, c_last, T_tile), lambda b, j: (b, 0, j)),
        scratch_shapes=[pltpu.VMEM((Cin, T_tile + 2 * halo), compute_dtype)],
        compiler_params=pltpu.CompilerParams(
            dimension_semantics=("parallel", "parallel")),
    )(x, x, x, *flat_args)


# ------------------------------- FC kernel --------------------------------

def _fc_kernel(x_ref, w_ref, b_ref, o_ref, acc_ref):
    k = pl.program_id(0)

    @pl.when(k == 0)
    def _():
        acc_ref[...] = jnp.zeros_like(acc_ref)

    # x: (B, f_tile), w: (C, f_tile) lane-dense -> contract the F axis.
    acc_ref[...] += lax.dot_general(
        x_ref[...], w_ref[...],
        dimension_numbers=(((1,), (1,)), ((), ())),
        preferred_element_type=jnp.float32)

    @pl.when(k == pl.num_programs(0) - 1)
    def _():
        o_ref[...] = (acc_ref[...] + b_ref[...]).astype(o_ref.dtype)


def linear(x, w_t, b, *, f_tile=32768, compute_dtype=jnp.float32):
    """x: (B, F), w_t: (C, F) lane-dense, b: (C,) -> (B, C) f32."""
    B, F = x.shape
    C = w_t.shape[0]
    f_tile = min(f_tile, _round_up(F, 256))
    F_pad = _round_up(F, f_tile)
    if F_pad != F:
        x = jnp.pad(x, ((0, 0), (0, F_pad - F)))
        w_t = jnp.pad(w_t, ((0, 0), (0, F_pad - F)))
    x = x.astype(compute_dtype)
    w_t = w_t.astype(compute_dtype)
    nF = F_pad // f_tile
    return pl.pallas_call(
        _fc_kernel,
        out_shape=jax.ShapeDtypeStruct((B, C), jnp.float32),
        grid=(nF,),
        in_specs=[
            pl.BlockSpec((B, f_tile), lambda k: (0, k)),
            pl.BlockSpec((C, f_tile), lambda k: (0, k)),
            pl.BlockSpec((1, C), lambda k: (0, 0)),
        ],
        out_specs=pl.BlockSpec((B, C), lambda k: (0, 0)),
        scratch_shapes=[pltpu.VMEM((B, C), jnp.float32)],
        compiler_params=pltpu.CompilerParams(
            dimension_semantics=("arbitrary",)),
    )(x, w_t, b.reshape(1, C).astype(jnp.float32))


# ------------------------------ Model glue ------------------------------

def fold_bn_into_conv(w, b, gamma, beta, mean, var, eps=1e-5):
    """w: (Cout, Cin, K) PyTorch layout -> taps (K, Cout, Cin), bias (Cout,)."""
    scale = gamma / jnp.sqrt(var + eps)                     # (Cout,)
    w_fused = w * scale[:, None, None]                      # (Cout, Cin, K)
    b_fused = (b - mean) * scale + beta                     # (Cout,)
    w_taps = jnp.transpose(w_fused, (2, 0, 1))              # (K, Cout, Cin)
    return w_taps, b_fused


def init_params(key, input_dim, num_filters, num_layers, kernel_size, seq_len,
                num_classes):
    params = {"layers": []}
    in_ch = input_dim
    for _ in range(num_layers):
        key, k1, k2, k3, k4, k5, k6 = jax.random.split(key, 7)
        conv_w = 0.1 * jax.random.normal(k1, (num_filters, in_ch, kernel_size),
                                         jnp.float32)
        conv_b = 0.1 * jax.random.normal(k2, (num_filters,), jnp.float32)
        gamma = 1.0 + 0.1 * jax.random.normal(k3, (num_filters,), jnp.float32)
        beta = 0.1 * jax.random.normal(k4, (num_filters,), jnp.float32)
        r_mean = 0.1 * jax.random.normal(k5, (num_filters,), jnp.float32)
        r_var = jnp.abs(1.0 + 0.1 * jax.random.normal(k6, (num_filters,),
                                                      jnp.float32))
        params["layers"].append(
            dict(w=conv_w, b=conv_b, gamma=gamma, beta=beta,
                 mean=r_mean, var=r_var))
        in_ch = num_filters
    key, kf1, kf2 = jax.random.split(key, 3)
    feat = num_filters * seq_len
    params["fc_w"] = 0.02 * jax.random.normal(kf1, (feat, num_classes),
                                              jnp.float32)
    params["fc_b"] = 0.02 * jax.random.normal(kf2, (num_classes,), jnp.float32)
    return params


def eegcnn_forward(params, x, *, kernel_size, compute_dtype=jnp.float32,
                   conv_t_tile=1024, fc_f_tile=32768):
    # x: (B, T, C_in) — matches the PyTorch input before .transpose(1, 2).
    B, T, _ = x.shape
    xc = jnp.transpose(x, (0, 2, 1))                 # the module's transpose
    layers = [fold_bn_into_conv(l["w"], l["b"], l["gamma"], l["beta"],
                                l["mean"], l["var"])
              for l in params["layers"]]
    h = fused_conv_bn_relu_stack(xc, layers, kernel_size=kernel_size,
                                 T_tile=conv_t_tile,
                                 compute_dtype=compute_dtype)  # (B, F, T_r)
    c_last, T_r = h.shape[1], h.shape[2]
    # Channel-major flatten (same as PyTorch reshape); NO time slice — padded
    # columns are neutralized by zero-padded FC weights below (free reshape,
    # no extra HBM round trip of the activations).
    h_flat = h.reshape(B, c_last * T_r)
    # dropout: identity (eval mode)
    fc_w = params["fc_w"]                                  # (c_last*T, C)
    C = fc_w.shape[1]
    w3 = fc_w.reshape(c_last, T, C)
    if T_r != T:
        w3 = jnp.pad(w3, ((0, 0), (0, T_r - T), (0, 0)))   # zero-pad time
    w_t = w3.reshape(c_last * T_r, C).T                    # lane-dense (C, F)
    return linear(h_flat, w_t, params["fc_b"], f_tile=fc_f_tile,
                  compute_dtype=compute_dtype)


# Pure-JAX reference for a correctness check.
def eegcnn_reference(params, x, *, kernel_size):
    pad = kernel_size // 2
    h = x                                            # (B, T, C)
    for lyr in params["layers"]:
        w_taps, b_f = fold_bn_into_conv(lyr["w"], lyr["b"], lyr["gamma"],
                                        lyr["beta"], lyr["mean"], lyr["var"])
        B, T, _ = h.shape
        hp = jnp.pad(h, ((0, 0), (pad, pad), (0, 0)))
        acc = jnp.zeros((B, T, w_taps.shape[1]), jnp.float32)
        for k in range(kernel_size):
            acc = acc + jnp.einsum("btc,fc->btf", hp[:, k:k + T, :], w_taps[k])
        h = jnp.maximum(acc + b_f, 0.0)
    B = h.shape[0]
    h_flat = jnp.transpose(h, (0, 2, 1)).reshape(B, -1)
    return h_flat @ params["fc_w"] + params["fc_b"]


if __name__ == "__main__":
    # Small shapes consistent with the module (T scaled down from 10000; the
    # fc in_features = num_filters * T follows).  T=300 with conv_t_tile=128
    # gives a multi-tile grid (3 time tiles) AND a padded tail (T_r=384 > T),
    # exercising both the halo strips and the boundary masking.
    B, T, C_IN = 2, 300, 20
    NUM_FILTERS, NUM_LAYERS, KSIZE, NUM_CLASSES = 32, 2, 5, 6

    key = jax.random.PRNGKey(0)
    key, kx = jax.random.split(key)
    x = jax.random.normal(kx, (B, T, C_IN), jnp.float32)
    params = init_params(key, C_IN, NUM_FILTERS, NUM_LAYERS, KSIZE, T,
                         NUM_CLASSES)

    ref = eegcnn_reference(params, x, kernel_size=KSIZE)

    # f32 path, multi-tile conv grid.  Tolerance covers the XLA reference
    # running at TPU default (bf16-pass) matmul precision vs the kernel's
    # f32-accumulated MXU dots.
    fwd = jax.jit(functools.partial(eegcnn_forward, kernel_size=KSIZE,
                                    conv_t_tile=128))
    out = jax.block_until_ready(fwd(params, x))
    assert out.shape == (B, NUM_CLASSES)
    assert jnp.allclose(out, ref, atol=2e-2, rtol=2e-2), (
        float(jnp.max(jnp.abs(out - ref))))

    # f32 path with the default large-tile configuration (single time tile).
    fwd_big = jax.jit(functools.partial(eegcnn_forward, kernel_size=KSIZE))
    out_big = jax.block_until_ready(fwd_big(params, x))
    assert jnp.allclose(out_big, ref, atol=2e-2, rtol=2e-2), (
        float(jnp.max(jnp.abs(out_big - ref))))

    # bf16 MXU/HBM path (usable on v5e/v6e/v7x): bf16 operands, f32 accum.
    fwd_bf16 = jax.jit(functools.partial(eegcnn_forward, kernel_size=KSIZE,
                                         compute_dtype=jnp.bfloat16))
    out_bf16 = jax.block_until_ready(fwd_bf16(params, x))
    assert out_bf16.shape == (B, NUM_CLASSES)
    assert jnp.allclose(out_bf16, ref, atol=2e-1, rtol=2e-1), (
        float(jnp.max(jnp.abs(out_bf16 - ref))))

    print("KERNEL_OK")
</pallas_src>

<mosaic_0001>
module attributes {stable_mosaic.version = 11 : i64} {
  func.func @_fused_conv_kernel(%arg0: i32, %arg1: i32, %arg2: memref<1x20x128xf32, #tpu.memory_space<vmem>>, %arg3: memref<1x20x128xf32, #tpu.memory_space<vmem>>, %arg4: memref<1x20x128xf32, #tpu.memory_space<vmem>>, %arg5: memref<32x100xf32, #tpu.memory_space<vmem>>, %arg6: memref<32x1xf32, #tpu.memory_space<vmem>>, %arg7: memref<32x160xf32, #tpu.memory_space<vmem>>, %arg8: memref<32x1xf32, #tpu.memory_space<vmem>>, %arg9: memref<1x32x128xf32, #tpu.memory_space<vmem>>, %arg10: memref<20x136xf32, #tpu.memory_space<vmem>>) attributes {dimension_semantics = [#tpu.dimension_semantics<parallel>, #tpu.dimension_semantics<parallel>], iteration_bounds = array<i64: 2, 3>, scalar_prefetch = 0 : i64, scratch_operands = 1 : i64, tpu.core_type = #tpu.core_type<tc>, window_params = [{transform_indices = @transform_0, window_bounds = array<i64: 1, 20, 128>}, {transform_indices = @transform_1, window_bounds = array<i64: 1, 20, 128>}, {transform_indices = @transform_2, window_bounds = array<i64: 1, 20, 128>}, {pipeline_mode = #tpu.pipeline_mode<synchronous>, transform_indices = @transform_3, window_bounds = array<i64: 32, 100>}, {pipeline_mode = #tpu.pipeline_mode<synchronous>, transform_indices = @transform_4, window_bounds = array<i64: 32, 1>}, {pipeline_mode = #tpu.pipeline_mode<synchronous>, transform_indices = @transform_5, window_bounds = array<i64: 32, 160>}, {pipeline_mode = #tpu.pipeline_mode<synchronous>, transform_indices = @transform_6, window_bounds = array<i64: 32, 1>}, {transform_indices = @transform_7, window_bounds = array<i64: 1, 32, 128>}]} {
    %c0 = arith.constant 0 : index
    %c0_0 = arith.constant 0 : index
    %c124 = arith.constant 124 : index
    %0 = vector.load %arg3[%c0, %c0_0, %c124] : memref<1x20x128xf32, #tpu.memory_space<vmem>>, vector<1x20x4xf32>
    %1 = vector.shape_cast %0 : vector<1x20x4xf32> to vector<20x4xf32>
    %c0_1 = arith.constant 0 : index
    %c0_2 = arith.constant 0 : index
    %2 = vector.load %arg10[%c0_1, %c0_2] : memref<20x136xf32, #tpu.memory_space<vmem>>, vector<20x4xf32>
    tpu.vector_store %arg10[%c0_1, %c0_2], %1 {strides = array<i32>} : memref<20x136xf32, #tpu.memory_space<vmem>>, vector<20x4xf32>,
    %c0_3 = arith.constant 0 : index
    %c0_4 = arith.constant 0 : index
    %c0_5 = arith.constant 0 : index
    %3 = vector.load %arg2[%c0_3, %c0_4, %c0_5] : memref<1x20x128xf32, #tpu.memory_space<vmem>>, vector<1x20x128xf32>
    %4 = vector.shape_cast %3 : vector<1x20x128xf32> to vector<20x128xf32>
    %c0_6 = arith.constant 0 : index
    %c4 = arith.constant 4 : index
    %5 = vector.load %arg10[%c0_6, %c4] : memref<20x136xf32, #tpu.memory_space<vmem>>, vector<20x128xf32>
    tpu.vector_store %arg10[%c0_6, %c4], %4 {strides = array<i32>} : memref<20x136xf32, #tpu.memory_space<vmem>>, vector<20x128xf32>,
    %c0_7 = arith.constant 0 : index
    %c0_8 = arith.constant 0 : index
    %c0_9 = arith.constant 0 : index
    %6 = vector.load %arg4[%c0_7, %c0_8, %c0_9] : memref<1x20x128xf32, #tpu.memory_space<vmem>>, vector<1x20x4xf32>
    %7 = vector.shape_cast %6 : vector<1x20x4xf32> to vector<20x4xf32>
    %c0_10 = arith.constant 0 : index
    %c132 = arith.constant 132 : index
    %8 = vector.load %arg10[%c0_10, %c132] : memref<20x136xf32, #tpu.memory_space<vmem>>, vector<20x4xf32>
    tpu.vector_store %arg10[%c0_10, %c132], %7 {strides = array<i32>} : memref<20x136xf32, #tpu.memory_space<vmem>>, vector<20x4xf32>,
    %c128_i32 = arith.constant 128 : i32
    %9 = arith.muli %arg1, %c128_i32 : i32
    %c4_i32 = arith.constant 4 : i32
    %10 = arith.subi %9, %c4_i32 : i32
    %11 = tpu.iota {dimensions = array<i32: 1>} : vector<1x136xi32>
    %12 = vector.broadcast %10 : i32 to vector<1x136xi32>
    %13 = arith.addi %12, %11 : vector<1x136xi32>
    %c0_i32 = arith.constant 0 : i32
    %14 = vector.broadcast %c0_i32 : i32 to vector<1x136xi32>
    %15 = arith.cmpi sge, %13, %14 : vector<1x136xi32>
    %c300_i32 = arith.constant 300 : i32
    %16 = vector.broadcast %c300_i32 : i32 to vector<1x136xi32>
    %17 = arith.cmpi slt, %13, %16 : vector<1x136xi32>
    %18 = arith.andi %15, %17 : vector<1x136xi1>
    %c0_11 = arith.constant 0 : index
    %c0_12 = arith.constant 0 : index
    %19 = vector.load %arg10[%c0_11, %c0_12] : memref<20x136xf32, #tpu.memory_space<vmem>>, vector<20x136xf32>
    %cst = arith.constant 0.000000e+00 : f32
    %20 = vector.shape_cast %18 : vector<1x136xi1> to vector<1x136xi1>
    %21 = vector.broadcast %20 : vector<1x136xi1> to vector<20x136xi1>
    %22 = vector.broadcast %cst : f32 to vector<20x136xf32>
    %23 = arith.select %21, %19, %22 : vector<20x136xi1>, vector<20x136xf32>
    %24 = vector.extract_strided_slice %23 {offsets = [0, 0], sizes = [20, 132], strides = [1, 1]} : vector<20x136xf32> to vector<20x132xf32>
    %25 = vector.extract_strided_slice %23 {offsets = [0, 1], sizes = [20, 132], strides = [1, 1]} : vector<20x136xf32> to vector<20x132xf32>
    %26 = vector.extract_strided_slice %23 {offsets = [0, 2], sizes = [20, 132], strides = [1, 1]} : vector<20x136xf32> to vector<20x132xf32>
    %27 = vector.extract_strided_slice %23 {offsets = [0, 3], sizes = [20, 132], strides = [1, 1]} : vector<20x136xf32> to vector<20x132xf32>
    %28 = vector.extract_strided_slice %23 {offsets = [0, 4], sizes = [20, 132], strides = [1, 1]} : vector<20x136xf32> to vector<20x132xf32>
    %29 = tpu.concatenate %24, %25, %26, %27, %28 in 0 : vector<20x132xf32>, vector<20x132xf32>, vector<20x132xf32>, vector<20x132xf32>, vector<20x132xf32> -> vector<100x132xf32>
    %c0_13 = arith.constant 0 : index
    %c0_14 = arith.constant 0 : index
    %30 = vector.load %arg5[%c0_13, %c0_14] : memref<32x100xf32, #tpu.memory_space<vmem>>, vector<32x100xf32>
    %cst_15 = arith.constant dense<0.000000e+00> : vector<32x132xf32>
    %31 = tpu.matmul %30, %29, %cst_15 {dimension_numbers = #tpu.dot_dimension_numbers<[1], [0], [0], [1], [0, 0, 1, 1], [], []>} : vector<32x100xf32>, vector<100x132xf32>, vector<32x132xf32> -> vector<32x132xf32>
    %c0_16 = arith.constant 0 : index
    %c0_17 = arith.constant 0 : index
    %32 = vector.load %arg6[%c0_16, %c0_17] : memref<32x1xf32, #tpu.memory_space<vmem>>, vector<32x1xf32>
    %33 = vector.broadcast %32 : vector<32x1xf32> to vector<32x132xf32>
    %34 = arith.addf %31, %33 : vector<32x132xf32>
    %cst_18 = arith.constant 0.000000e+00 : f32
    %35 = vector.broadcast %cst_18 : f32 to vector<32x132xf32>
    %36 = arith.maximumf %34, %35 : vector<32x132xf32>
    %c2_i32 = arith.constant 2 : i32
    %37 = arith.addi %10, %c2_i32 : i32
    %38 = tpu.iota {dimensions = array<i32: 1>} : vector<1x132xi32>
    %39 = vector.broadcast %37 : i32 to vector<1x132xi32>
    %40 = arith.addi %39, %38 : vector<1x132xi32>
    %c0_i32_19 = arith.constant 0 : i32
    %41 = vector.broadcast %c0_i32_19 : i32 to vector<1x132xi32>
    %42 = arith.cmpi sge, %40, %41 : vector<1x132xi32>
    %c300_i32_20 = arith.constant 300 : i32
    %43 = vector.broadcast %c300_i32_20 : i32 to vector<1x132xi32>
    %44 = arith.cmpi slt, %40, %43 : vector<1x132xi32>
    %45 = arith.andi %42, %44 : vector<1x132xi1>
    %cst_21 = arith.constant 0.000000e+00 : f32
    %46 = vector.shape_cast %45 : vector<1x132xi1> to vector<1x132xi1>
    %47 = vector.broadcast %46 : vector<1x132xi1> to vector<32x132xi1>
    %48 = vector.broadcast %cst_21 : f32 to vector<32x132xf32>
    %49 = arith.select %47, %36, %48 : vector<32x132xi1>, vector<32x132xf32>
    %50 = vector.extract_strided_slice %49 {offsets = [0, 0], sizes = [32, 128], strides = [1, 1]} : vector<32x132xf32> to vector<32x128xf32>
    %51 = vector.extract_strided_slice %49 {offsets = [0, 1], sizes = [32, 128], strides = [1, 1]} : vector<32x132xf32> to vector<32x128xf32>
    %52 = vector.extract_strided_slice %49 {offsets = [0, 2], sizes = [32, 128], strides = [1, 1]} : vector<32x132xf32> to vector<32x128xf32>
    %53 = vector.extract_strided_slice %49 {offsets = [0, 3], sizes = [32, 128], strides = [1, 1]} : vector<32x132xf32> to vector<32x128xf32>
    %54 = vector.extract_strided_slice %49 {offsets = [0, 4], sizes = [32, 128], strides = [1, 1]} : vector<32x132xf32> to vector<32x128xf32>
    %55 = tpu.concatenate %50, %51, %52, %53, %54 in 0 : vector<32x128xf32>, vector<32x128xf32>, vector<32x128xf32>, vector<32x128xf32>, vector<32x128xf32> -> vector<160x128xf32>
    %c0_22 = arith.constant 0 : index
    %c0_23 = arith.constant 0 : index
    %56 = vector.load %arg7[%c0_22, %c0_23] : memref<32x160xf32, #tpu.memory_space<vmem>>, vector<32x160xf32>
    %cst_24 = arith.constant dense<0.000000e+00> : vector<32x128xf32>
    %57 = tpu.matmul %56, %55, %cst_24 {dimension_numbers = #tpu.dot_dimension_numbers<[1], [0], [0], [1], [0, 0, 1, 1], [], []>} : vector<32x160xf32>, vector<160x128xf32>, vector<32x128xf32> -> vector<32x128xf32>
    %c0_25 = arith.constant 0 : index
    %c0_26 = arith.constant 0 : index
    %58 = vector.load %arg8[%c0_25, %c0_26] : memref<32x1xf32, #tpu.memory_space<vmem>>, vector<32x1xf32>
    %59 = vector.broadcast %58 : vector<32x1xf32> to vector<32x128xf32>
    %60 = arith.addf %57, %59 : vector<32x128xf32>
    %cst_27 = arith.constant 0.000000e+00 : f32
    %61 = vector.broadcast %cst_27 : f32 to vector<32x128xf32>
    %62 = arith.maximumf %60, %61 : vector<32x128xf32>
    %c0_28 = arith.constant 0 : index
    %c0_29 = arith.constant 0 : index
    %c0_30 = arith.constant 0 : index
    %63 = vector.load %arg9[%c0_28, %c0_29, %c0_30] : memref<1x32x128xf32, #tpu.memory_space<vmem>>, vector<1x32x128xf32>
    %64 = vector.shape_cast %63 : vector<1x32x128xf32> to vector<32x128xf32>
    %65 = vector.shape_cast %62 : vector<32x128xf32> to vector<1x32x128xf32>
    tpu.vector_store %arg9[%c0_28, %c0_29, %c0_30], %65 {strides = array<i32>} : memref<1x32x128xf32, #tpu.memory_space<vmem>>, vector<1x32x128xf32>,
    return
  }
  func.func @transform_0(%arg0: i32, %arg1: i32) -> (i32, i32, i32) {
    %c0_i32 = arith.constant 0 : i32
    %c0_i32_0 = arith.constant 0 : i32
    return %arg0, %c0_i32, %arg1 : i32, i32, i32
  }
  func.func @transform_1(%arg0: i32, %arg1: i32) -> (i32, i32, i32) {
    %c1_i32 = arith.constant 1 : i32
    %0 = arith.muli %arg1, %c1_i32 : i32
    %c1_i32_0 = arith.constant 1 : i32
    %1 = arith.subi %0, %c1_i32_0 : i32
    %c0_i32 = arith.constant 0 : i32
    %2 = arith.maxsi %1, %c0_i32 : i32
    %c0_i32_1 = arith.constant 0 : i32
    %c0_i32_2 = arith.constant 0 : i32
    return %arg0, %c0_i32_1, %2 : i32, i32, i32
  }
  func.func @transform_2(%arg0: i32, %arg1: i32) -> (i32, i32, i32) {
    %c1_i32 = arith.constant 1 : i32
    %0 = arith.muli %arg1, %c1_i32 : i32
    %c1_i32_0 = arith.constant 1 : i32
    %1 = arith.addi %0, %c1_i32_0 : i32
    %c2_i32 = arith.constant 2 : i32
    %2 = arith.minsi %1, %c2_i32 : i32
    %c0_i32 = arith.constant 0 : i32
    %c0_i32_1 = arith.constant 0 : i32
    return %arg0, %c0_i32, %2 : i32, i32, i32
  }
  func.func @transform_3(%arg0: i32, %arg1: i32) -> (i32, i32) {
    %c0_i32 = arith.constant 0 : i32
    %c0_i32_0 = arith.constant 0 : i32
    %c0_i32_1 = arith.constant 0 : i32
    return %c0_i32, %c0_i32_0 : i32, i32
  }
  func.func @transform_4(%arg0: i32, %arg1: i32) -> (i32, i32) {
    %c0_i32 = arith.constant 0 : i32
    %c0_i32_0 = arith.constant 0 : i32
    %c0_i32_1 = arith.constant 0 : i32
    return %c0_i32, %c0_i32_0 : i32, i32
  }
  func.func @transform_5(%arg0: i32, %arg1: i32) -> (i32, i32) {
    %c0_i32 = arith.constant 0 : i32
    %c0_i32_0 = arith.constant 0 : i32
    %c0_i32_1 = arith.constant 0 : i32
    return %c0_i32, %c0_i32_0 : i32, i32
  }
  func.func @transform_6(%arg0: i32, %arg1: i32) -> (i32, i32) {
    %c0_i32 = arith.constant 0 : i32
    %c0_i32_0 = arith.constant 0 : i32
    %c0_i32_1 = arith.constant 0 : i32
    return %c0_i32, %c0_i32_0 : i32, i32
  }
  func.func @transform_7(%arg0: i32, %arg1: i32) -> (i32, i32, i32) {
    %c0_i32 = arith.constant 0 : i32
    %c0_i32_0 = arith.constant 0 : i32
    return %arg0, %c0_i32, %arg1 : i32, i32, i32
  }
}

module attributes {stable_mosaic.version = 11 : i64} {
  func.func @_fc_kernel(%arg0: i32, %arg1: memref<2x12288xf32, #tpu.memory_space<vmem>>, %arg2: memref<6x12288xf32, #tpu.memory_space<vmem>>, %arg3: memref<1x6xf32, #tpu.memory_space<vmem>>, %arg4: memref<2x6xf32, #tpu.memory_space<vmem>>, %arg5: memref<2x6xf32, #tpu.memory_space<vmem>>) attributes {dimension_semantics = [#tpu.dimension_semantics<arbitrary>], iteration_bounds = array<i64: 1>, scalar_prefetch = 0 : i64, scratch_operands = 1 : i64, tpu.core_type = #tpu.core_type<tc>, window_params = [{transform_indices = @transform_0, window_bounds = array<i64: 2, 12288>}, {transform_indices = @transform_1, window_bounds = array<i64: 6, 12288>}, {pipeline_mode = #tpu.pipeline_mode<synchronous>, transform_indices = @transform_2, window_bounds = array<i64: 1, 6>}, {pipeline_mode = #tpu.pipeline_mode<synchronous>, transform_indices = @transform_3, window_bounds = array<i64: 2, 6>}]} {
    %c0_i32 = arith.constant 0 : i32
    %0 = arith.cmpi eq, %arg0, %c0_i32 : i32
    %1 = arith.extui %0 : i1 to i32
    %c0_i32_0 = arith.constant 0 : i32
    %2 = arith.cmpi ne, %1, %c0_i32_0 : i32
    scf.if %2 {
      %cst_10 = arith.constant 0.000000e+00 : f32
      %12 = vector.broadcast %cst_10 : f32 to vector<2x6xf32>
      %c0_11 = arith.constant 0 : index
      %c0_12 = arith.constant 0 : index
      %13 = vector.load %arg5[%c0_11, %c0_12] : memref<2x6xf32, #tpu.memory_space<vmem>>, vector<2x6xf32>
      tpu.vector_store %arg5[%c0_11, %c0_12], %12 {strides = array<i32>} : memref<2x6xf32, #tpu.memory_space<vmem>>, vector<2x6xf32>,
    } else {
    }
    %c0 = arith.constant 0 : index
    %c0_1 = arith.constant 0 : index
    %3 = vector.load %arg5[%c0, %c0_1] : memref<2x6xf32, #tpu.memory_space<vmem>>, vector<2x6xf32>
    %c0_2 = arith.constant 0 : index
    %c0_3 = arith.constant 0 : index
    %4 = vector.load %arg1[%c0_2, %c0_3] : memref<2x12288xf32, #tpu.memory_space<vmem>>, vector<2x12288xf32>
    %c0_4 = arith.constant 0 : index
    %c0_5 = arith.constant 0 : index
    %5 = vector.load %arg2[%c0_4, %c0_5] : memref<6x12288xf32, #tpu.memory_space<vmem>>, vector<6x12288xf32>
    %cst = arith.constant dense<0.000000e+00> : vector<2x6xf32>
    %6 = tpu.matmul %4, %5, %cst {dimension_numbers = #tpu.dot_dimension_numbers<[1], [1], [0], [0], [0, 0, 1, 0], [], []>} : vector<2x12288xf32>, vector<6x12288xf32>, vector<2x6xf32> -> vector<2x6xf32>
    %7 = arith.addf %3, %6 : vector<2x6xf32>
    %c0_6 = arith.constant 0 : index
    %c0_7 = arith.constant 0 : index
    %8 = vector.load %arg5[%c0_6, %c0_7] : memref<2x6xf32, #tpu.memory_space<vmem>>, vector<2x6xf32>
    tpu.vector_store %arg5[%c0_6, %c0_7], %7 {strides = array<i32>} : memref<2x6xf32, #tpu.memory_space<vmem>>, vector<2x6xf32>,
    %c0_i32_8 = arith.constant 0 : i32
    %9 = arith.cmpi eq, %arg0, %c0_i32_8 : i32
    %10 = arith.extui %9 : i1 to i32
    %c0_i32_9 = arith.constant 0 : i32
    %11 = arith.cmpi ne, %10, %c0_i32_9 : i32
    scf.if %11 {
      %c0_10 = arith.constant 0 : index
      %c0_11 = arith.constant 0 : index
      %12 = vector.load %arg5[%c0_10, %c0_11] : memref<2x6xf32, #tpu.memory_space<vmem>>, vector<2x6xf32>
      %c0_12 = arith.constant 0 : index
      %c0_13 = arith.constant 0 : index
      %13 = vector.load %arg3[%c0_12, %c0_13] : memref<1x6xf32, #tpu.memory_space<vmem>>, vector<1x6xf32>
      %14 = vector.broadcast %13 : vector<1x6xf32> to vector<2x6xf32>
      %15 = arith.addf %12, %14 : vector<2x6xf32>
      %c0_14 = arith.constant 0 : index
      %c0_15 = arith.constant 0 : index
      %16 = vector.load %arg4[%c0_14, %c0_15] : memref<2x6xf32, #tpu.memory_space<vmem>>, vector<2x6xf32>
      tpu.vector_store %arg4[%c0_14, %c0_15], %15 {strides = array<i32>} : memref<2x6xf32, #tpu.memory_space<vmem>>, vector<2x6xf32>,
    } else {
    }
    return
  }
  func.func @transform_0(%arg0: i32) -> (i32, i32) {
    %c0_i32 = arith.constant 0 : i32
    %c0_i32_0 = arith.constant 0 : i32
    return %c0_i32, %arg0 : i32, i32
  }
  func.func @transform_1(%arg0: i32) -> (i32, i32) {
    %c0_i32 = arith.constant 0 : i32
    %c0_i32_0 = arith.constant 0 : i32
    return %c0_i32, %arg0 : i32, i32
  }
  func.func @transform_2(%arg0: i32) -> (i32, i32) {
    %c0_i32 = arith.constant 0 : i32
    %c0_i32_0 = arith.constant 0 : i32
    %c0_i32_1 = arith.constant 0 : i32
    return %c0_i32, %c0_i32_0 : i32, i32
  }
  func.func @transform_3(%arg0: i32) -> (i32, i32) {
    %c0_i32 = arith.constant 0 : i32
    %c0_i32_0 = arith.constant 0 : i32
    %c0_i32_1 = arith.constant 0 : i32
    return %c0_i32, %c0_i32_0 : i32, i32
  }
}

</mosaic_0001>

<bundles_post_ra>
// kernel: eegcnn_forward.2
= control target key start
LH: loop header
LB: loop body
LE: loop exit
PB: predicated region body
PF: predicated region fallthrough
CT: control target
= control target key end

     0   :  { %s2158_s0 = inlined_call_operand.vmem [shape: f32[2,20,384], index: 0, kind: input, shape index: {}, may-alias: {0,1,2}]   ;;  %s2159_s1 = inlined_call_operand.vmem [shape: f32[2,20,384], index: 1, kind: input, shape index: {}, may-alias: {0,1,2}]   ;;  %s2160_s2 = inlined_call_operand.vmem [shape: f32[2,20,384], index: 2, kind: input, shape index: {}, may-alias: {0,1,2}]   ;;  %s2161_s3 = inlined_call_operand.vmem [shape: f32[32,100], index: 3, kind: input, shape index: {}]   ;;  %s2162_s4 = inlined_call_operand.vmem [shape: f32[32,1], index: 4, kind: input, shape index: {}]   ;;  %s2163_s5 = inlined_call_operand.vmem [shape: f32[32,160], index: 5, kind: input, shape index: {}]   ;;  %s2164_s6 = inlined_call_operand.vmem [shape: f32[32,1], index: 6, kind: input, shape index: {}]   ;;  %s2165_s7 = inlined_call_operand.vmem [shape: f32[2,32,384], index: 7, kind: output, shape index: {}]  }
   0x1   :  { %2171 = sst [smem:[#allocation13_spill]] %s2163_s5 }
   0x2   :  { %2172 = sst [smem:[#allocation14_spill]] %s2164_s6 }
   0x3   :  { %2173 = sst [smem:[#allocation15_spill]] %s2165_s7 }
   0x4   :  { %s1735_s24 = smov 0   ;;  %s1737_s25 = smov 0  }
   0x5   :  { %s1739_s26 = smov 0   ;;  %s1741_s27 = smov 0  }
   0x6   :  { %s1743_s28 = smov 0   ;;  %s1745_s29 = smov 0  }
   0x7   :  { %s1747_s30 = smov 0   ;;  %s1749_s8 = smov 0  }
   0x8   :  { %s1751_s9 = smov 0   ;;  %s1753_s10 = smov 0  }
   0x9   :  { %s1755_s11 = smov 0  }
   0xa LB: > { %2174 = sst [smem:[#allocation7_spill]] %s1673_s8  ;;  %s26_s13 = sadd.s32 1, %s1677_s9  ;;  %s1685_s11 = sphi %s1755_s11, %s17_s11   ;;  %s1681_s10 = sphi %s1753_s10, %s2211_s10   ;;  %s1677_s9 = sphi %s1751_s9, %s2210_s9   ;;  %s1673_s8 = sphi %s1749_s8, %s2209_s8   ;;  %s1669_s30 = sphi %s1747_s30, %s2208_s30   ;;  %s1665_s29 = sphi %s1745_s29, %s2207_s29   ;;  %s1661_s28 = sphi %s1743_s28, %s2206_s28   ;;  %s1657_s27 = sphi %s1741_s27, %s2205_s27   ;;  %s1653_s26 = sphi %s1739_s26, %s2204_s26   ;;  %s1649_s25 = sphi %s1737_s25, %s2203_s25   ;;  %s1645_s24 = sphi %s1735_s24, %s2202_s24  }
   0xb   : > { %p27_p0 = scmp.ge.s32.totalorder %s26_s13, 3  ;;  %s29_s14 = sadd.s32 1, %s1681_s10 }
   0xc   : > { %s38_s15 = sadd.s32 1, %s1665_s29  ;;  %p45_p1 = scmp.ne.s32.totalorder %s1665_s29, %s1661_s28 }
   0xd   : > { %s1796_s16 = scalar_select %p27_p0, 0, %s26_s13  }
   0xe   : > { %s2213_s14 = smov (!%p27_p0, %s29_s14), %s1681_s10  ;;  %p46_p2 = scmp.eq.s32.totalorder %s1685_s11, 0 }
   0xf   : > { %2175 = sst [smem:[#allocation8_spill]] %s1796_s16  ;;  %s34_s17 = ssub.s32 %s1677_s9, %s1796_s16 }
  0x10   : > { %p31_p3 = scmp.ge.s32.totalorder %s2213_s14, 2  ;;  %s1264_s18 = sadd.s32 4294967295, %s1677_s9 }
  0x11   : > { %p1808_p4 = por %p46_p2, %p45_p1  ;;  %p62_p5 = scmp.gt.s32.totalorder %s1264_s18, 0 }
  0x12   : > { %s2215_s14 = smov (%p31_p3, %s2213_s14), 0  ;;  %s1265_s21 = sadd.s32 4294967295, %s1796_s16 }
  0x13   : > { %2177 = sst [smem:[#allocation9_spill]] %s2215_s14  ;;  %s2217_s18 = smov (!%p62_p5, %s1264_s18), 0 }
  0x14   : > { %s33_s20 = ssub.s32 %s1681_s10, %s2215_s14  ;;  %p65_p6 = scmp.gt.s32.totalorder %s1265_s21, 0 }
  0x15   : > { %s35_s22 = sor.u32 %s34_s17, %s33_s20  ;;  %s72_s23 = sadd.s32 1, %s1657_s27 }
  0x16   : > { %p36_p7 = scmp.eq.s32.totalorder %s35_s22, 0  ;;  %s2219_s21 = smov (!%p65_p6, %s1265_s21), 0 }
  0x17   : > { %s68_s7 = ssub.s32 %s2217_s18, %s2219_s21  ;;  %p79_p8 = scmp.ne.s32.totalorder %s1657_s27, %s1653_s26 }
  0x18   : > { %s1821_s12 = scalar_select %p36_p7, %s1665_s29, %s38_s15  }
  0x19   : > { %s69_s8 = sor.u32 %s68_s7, %s33_s20  ;;  %p96_p9 = scmp.lt.s32.totalorder %s26_s13, 2 }
  0x1a   : > { %2178 = sst [smem:[#allocation10_spill]] %s1821_s12  ;;  %p70_p10 = scmp.eq.s32.totalorder %s69_s8, 0 }
  0x1b   : > { %p1828_p11 = por %p79_p8, %p46_p2  ;;  %s2221_s13 = smov (!%p96_p9, %s26_s13), 2 }
  0x1c   : > { %s1835_s22 = scalar_select %p70_p10, %s1657_s27, %s72_s23  }
  0x1d   : > { %s98_s14 = sadd.s32 1, %s1796_s16  ;;  %p113_p13 = scmp.ne.s32.totalorder %s1649_s25, %s1645_s24 }
  0x1e   : > { %2180 = sst [smem:[#allocation11_spill]] %s1835_s22  ;;  %p99_p12 = scmp.lt.s32.totalorder %s98_s14, 2 }
  0x1f   : > { %s2181_s15 = sadd.s32 4294967295, %s1685_s11   ;;  %p1844_p3 = por %p113_p13, %p46_p2 }
  0x20   : > { %p229_p0 = scmp.eq.s32.totalorder %s2181_s15, 5  ;;  %s2223_s14 = smov (!%p99_p12, %s98_s14), 2 }
  0x21   : > { %s102_s21 = ssub.s32 %s2221_s13, %s2223_s14  ;;  %s106_s23 = sadd.s32 1, %s1649_s25 }
  0x22   : > { %p1851_p5 = por %p229_p0, %p45_p1  ;;  %s103_s12 = sor.u32 %s102_s21, %s33_s20 }
  0x23   : > { %p104_p6 = scmp.eq.s32.totalorder %s103_s12, 0  ;;  %p1267_p7 = scmp.ge.s32.totalorder %s1685_s11, 6 }
  0x24   : > { %s2183_s8 = scalar_select %p1851_p5, 1, 0 }
  0x25   : > { %s1858_s16 = scalar_select %p104_p6, %s1649_s25, %s106_s23  }
  0x26   : > { %2184 = sst [smem:[#allocation12_spill]] %s2183_s8  ;;  %263 = sbr.rel (%p1267_p7) target bundleno = 72 (0x48), region = 32 }
  0x2d   : > { %266 = sbr.rel (!%p1808_p4) target bundleno = 54 (0x36), region = 36  ;;  %s268_s15 = sand.u32 (%p1808_p4), 1, %s1665_s29  }
  0x2e   : > { %s1357_s22 = smul.u32 (%p1808_p4), 9, %s1681_s10 }
  0x2f   : > { %s1356_s6 = smul.u32 (%p1808_p4), 24, %s268_s15 }
  0x30   : > { %s272_s5 = sadd.s32 (%p1808_p4), %s1677_s9, %s1357_s22 }
  0x31   : > { %s1268_s8 = sshll.u32 (%p1808_p4), %s272_s5, 3  ;;  %s270_s21 = scalar_lea.vmem (%p1808_p4), [#allocation3], %s1356_s6 }
  0x32   : > { %s274_s12 = scalar_lea.vmem (%p1808_p4), %s2158_s0, %s1268_s8 }
  0x33   : > { %v306_v0 = vld [vmem:[%s274_s12] sm:$0xff] (%p1808_p4)  ;;  %v308_v1 = vld [vmem:[%s274_s12 + $0x18] sm:$0xff] (%p1808_p4)  ;;  %v310_v2 = vld [vmem:[%s274_s12 + $0x30] sm:$0xff] (%p1808_p4) }
  0x34   : > { %307 = vst [vmem:[%s270_s21] sm:$0xff] %v306_v0  ;;  %309 = vst [vmem:[%s270_s21 + $0x8] sm:$0xff] %v308_v1 }
  0x35   : > { %311 = vst [vmem:[%s270_s21 + $0x10] sm:$0xff] %v310_v2 }
  0x36 PF: > { %317 = sbr.rel (!%p1828_p11) target bundleno = 63 (0x3f), region = 74  ;;  %s319_s19 = sand.u32 (%p1828_p11), 1, %s1657_s27  }
  0x37   : > { %s1359_s5 = smul.u32 (%p1828_p11), 9, %s1681_s10 }
  0x38   : > { %s1358_s22 = smul.u32 (%p1828_p11), 24, %s319_s19 }
  0x39   : > { %s326_s23 = sadd.s32 (%p1828_p11), %s1359_s5, %s2217_s18 }
  0x3a   : > { %s1270_s15 = sshll.u32 (%p1828_p11), %s326_s23, 3  ;;  %s321_s6 = scalar_lea.vmem (%p1828_p11), [#allocation4], %s1358_s22 }
  0x3b   : > { %s328_s20 = scalar_lea.vmem (%p1828_p11), %s2159_s1, %s1270_s15 }
  0x3c   : > { %v360_v3 = vld [vmem:[%s328_s20] sm:$0xff] (%p1828_p11)  ;;  %v362_v4 = vld [vmem:[%s328_s20 + $0x18] sm:$0xff] (%p1828_p11)  ;;  %v364_v5 = vld [vmem:[%s328_s20 + $0x30] sm:$0xff] (%p1828_p11) }
  0x3d   : > { %361 = vst [vmem:[%s321_s6] sm:$0xff] %v360_v3  ;;  %363 = vst [vmem:[%s321_s6 + $0x8] sm:$0xff] %v362_v4 }
  0x3e   : > { %365 = vst [vmem:[%s321_s6 + $0x10] sm:$0xff] %v364_v5 }
  0x3f PF: > { %371 = sbr.rel (!%p1844_p3) target bundleno = 72 (0x48), region = 112  ;;  %s373_s18 = sand.u32 (%p1844_p3), 1, %s1649_s25  }
  0x40   : > { %s1361_s17 = smul.u32 (%p1844_p3), 9, %s1681_s10 }
  0x41   : > { %s1360_s12 = smul.u32 (%p1844_p3), 24, %s373_s18 }
  0x42   : > { %s380_s21 = sadd.s32 (%p1844_p3), %s1361_s17, %s2221_s13 }
  0x43   : > { %s1271_s19 = sshll.u32 (%p1844_p3), %s380_s21, 3  ;;  %s375_s22 = scalar_lea.vmem (%p1844_p3), [#allocation5], %s1360_s12 }
  0x44   : > { %s382_s15 = scalar_lea.vmem (%p1844_p3), %s2160_s2, %s1271_s19 }
  0x45   : > { %v414_v6 = vld [vmem:[%s382_s15] sm:$0xff] (%p1844_p3)  ;;  %v416_v7 = vld [vmem:[%s382_s15 + $0x18] sm:$0xff] (%p1844_p3)  ;;  %v418_v8 = vld [vmem:[%s382_s15 + $0x30] sm:$0xff] (%p1844_p3) }
  0x46   : > { %415 = vst [vmem:[%s375_s22] sm:$0xff] %v414_v6  ;;  %417 = vst [vmem:[%s375_s22 + $0x8] sm:$0xff] %v416_v7 }
  0x47   : > { %419 = vst [vmem:[%s375_s22 + $0x10] sm:$0xff] %v418_v8 }
  0x48 PF: > { %p1272_p1 = scmp.ge.s32.totalorder %s1685_s11, 1  ;;  %p424_p2 = scmp.lt.s32.totalorder %s1685_s11, 7 }
  0x4a   : > { %p425_p4 = pnand %p1272_p1, %p424_p2 }
  0x4b   : > { %s438_s13 = sand.u32 (!%p425_p4), 1, %s1653_s26   ;;  %s431_s8 = sand.u32 (!%p425_p4), 1, %s1661_s28   ;;  %v554_v13 = vlaneseq (!%p425_p4)  ;;  %vm504_vm0 = vcmask (!%p425_p4), 31744   ;;  %vm524_vm1 = vcmask (!%p425_p4), 1047584   ;;  %vm547_vm2 = vcmask (!%p425_p4), 64544   ;;  %v693_v4 = vld [vmem:[%s2162_s4] sm:$0xff] (!%p425_p4) }
  0x4c   : > { %428 = sbr.rel (%p425_p4) target bundleno = 980 (0x3d4), region = 150  ;;  %s445_s6 = sand.u32 (!%p425_p4), 1, %s1645_s24   ;;  %vm507_vm5 = vcmask (!%p425_p4), 27648   ;;  %vm529_vm6 = vcmask (!%p425_p4), 1043488   ;;  %vm550_vm10 = vcmask (!%p425_p4), 60448   ;;  %vm588_vm13 = vcmask (!%p425_p4), 1043456  }
  0x4d   : > { %s1363_s7 = smul.u32 (!%p425_p4), 24, %s438_s13  ;;  %s1687_s18 = smov (!%p425_p4), 4   ;;  %v555_v16 = vand.u32 (!%p425_p4), 127, %v554_v13  ;;  %v1692_v3 = vmov (!%p425_p4), 0.0   ;;  %v694_v5 = vld [vmem:[%s2162_s4 + $0x8] sm:$0xff] (!%p425_p4)  ;;  %v1693_v6 = vmov (!%p425_p4), 0  }
  0x4e   : > { %s1362_s14 = smul.u32 (!%p425_p4), 24, %s431_s8  ;;  %s1274_s21 = sshll.u32 (!%p425_p4), %s1669_s30, 7  ;;  %798 = vmatprep.mubr.f32.mxu0 (!%p425_p4), %v1692_v3  ;;  %1517 = vset.pattern.permute.xlu0 (!%p425_p4), %v1693_v6  ;;  %v695_v7 = vld [vmem:[%s2162_s4 + $0x10] sm:$0xff] (!%p425_p4)  ;;  %v696_v8 = vld [vmem:[%s2162_s4 + $0x18] sm:$0xff] (!%p425_p4)  ;;  %vm611_vm15 = vcmask (!%p425_p4), 1039360  }
  0x4f   : > { %s440_s20 = scalar_lea.vmem (!%p425_p4), [#allocation4], %s1363_s7  ;;  %s1364_s12 = smul.u32 (!%p425_p4), 24, %s445_s6  ;;  %v1900_v25 = vadd.s32 (!%p425_p4), 128, %v555_v16  ;;  %1518 = vset.pattern.permute.xlu1 (!%p425_p4), %v1693_v6 }
  0x50   : > { %v489_v9 = vld [vmem:[%s440_s20] sm:$0xff] (!%p425_p4)  ;;  %s433_s17 = scalar_lea.vmem (!%p425_p4), [#allocation3], %s1362_s14  ;;  %v490_v11 = vld [vmem:[%s440_s20 + $0x8] sm:$0xff] (!%p425_p4)  ;;  %s1893_s19 = sadd.s32 (!%p425_p4), 4294967294, %s1274_s21  ;;  %v491_v19 = vld [vmem:[%s440_s20 + $0x10] sm:$0xf] (!%p425_p4) }
  0x51   : > { %495 = vrot.lane.b32.xlu0 (!%p425_p4), %v489_v9, %s1687_s18  ;;  %v509_v10 = vld [vmem:[%s433_s17] sm:$0xff] (!%p425_p4)  ;;  %v510_v12 = vld [vmem:[%s433_s17 + $0x8] sm:$0xff] (!%p425_p4)  ;;  %s447_s26 = scalar_lea.vmem (!%p425_p4), [#allocation5], %s1364_s12  ;;  %v832_v17 = vstv (!%p425_p4), %s1893_s19  ;;  %s1275_s24 = sadd.s32 (!%p425_p4), 4294967292, %s1274_s21 }
  0x52   : > { %515 = vrot.lane.b32.xlu1 (!%p425_p4), %v509_v10, %s1687_s18  ;;  %v532_v14 = vld [vmem:[%s447_s26] sm:$0xff] (!%p425_p4)  ;;  %v533_v15 = vld [vmem:[%s447_s26 + $0x8] sm:$0xff] (!%p425_p4)  ;;  %v1898_v18 = vadd.s32 (!%p425_p4), %v832_v17, %v555_v16  ;;  %v511_v20 = vld [vmem:[%s433_s17 + $0x10] sm:$0xf] (!%p425_p4)  ;;  %s1688_s5 = smov (!%p425_p4), 127   ;;  %s1689_s23 = smov (!%p425_p4), 126  }
  0x53   : > { %v534_v21 = vld [vmem:[%s447_s26 + $0x10] sm:$0xf]  ;;  %v557_v24 = vstv %s1275_s24  ;;  %s1690_s15 = smov 125   ;;  %s1691_s22 = smov 124  }
  0x54   : > { %v558_v28 = vadd.s32 %v557_v24, %v555_v16  ;;  %v559_v29 = vadd.s32 %v557_v24, %v1900_v25  ;;  %s2194_s12 = sld [smem:[#allocation14_spill]]  ;;  %s2197_s17 = sld [smem:[#allocation15_spill]] (%p1851_p5) }
  0x55   : > { %497 = vrot.lane.b32.xlu0 %v490_v11, %s1687_s18 }
  0x56   : > { %517 = vrot.lane.b32.xlu1 %v510_v12, %s1687_s18  ;;  %vm560_vm3 = vcmp.ge.s32.totalorder %v558_v28, 0  ;;  %vm562_vm4 = vcmp.lt.s32.totalorder %v558_v28, 300  ;;  %vm561_vm7 = vcmp.ge.s32.totalorder %v559_v29, 0  ;;  %vm563_vm8 = vcmp.lt.s32.totalorder %v559_v29, 300 }
  0x57   : > { %vm1903_vm9 = vmand %vm560_vm3, %vm562_vm4  ;;  %vm717_vm3 = vcmask 818176   ;;  %vm835_vm4 = vcmp.ge.s32.totalorder %v1898_v18, 0 }
  0x58   : > { %vm1907_vm11 = vmand %vm561_vm7, %vm563_vm8 }
  0x59   : > { %538 = vrot.lane.b32.xlu0 %v532_v14, %s1687_s18  ;;  %vm1299_vm12 = vmpackc.low %vm1907_vm11, %vm1907_vm11 }
  0x5a   : > { %540 = vrot.lane.b32.xlu1 %v533_v15, %s1687_s18  ;;  %vm1302_vm14 = vmpackc.low %vm1903_vm9, %vm1903_vm9 }
  0x5d   : > { %499 = vrot.lane.b32.xlu0 %v491_v19, %s1687_s18 }
  0x5e   : > { %519 = vrot.lane.b32.xlu1 %v511_v20, %s1687_s18 }
  0x61   : > { %542 = vrot.lane.b32.xlu0 %v534_v21, %s1687_s18  ;;  %s2193_s18 = sld [smem:[#allocation13_spill]] }
  0xc3   : > { %v496_v22 = vpop.permute.xlu0 %495 }
  0xc4   : > { %505 = vst.msk [vmem:[#allocation2] sm:$0xff] %vm504_vm0, %v496_v22  ;;  %v516_v23 = vpop.permute.xlu1 %515 }
  0xc5   : > { %525 = vst.msk [vmem:[#allocation2] sm:$0xff] %vm524_vm1, %v516_v23 }
  0xc6   : > { %526 = vst.msk [vmem:[#allocation2 + $0x8] sm:$0xff] %vm504_vm0, %v516_v23 }
  0xc7   : > { %v498_v26 = vpop.permute.xlu0 %497 }
  0xc8   : > { %506 = vst.msk [vmem:[#allocation2 + $0x10] sm:$0xff] %vm504_vm0, %v498_v26  ;;  %v518_v27 = vpop.permute.xlu1 %517 }
  0xc9   : > { %527 = vst.msk [vmem:[#allocation2 + $0x10] sm:$0xff] %vm524_vm1, %v518_v27  ;;  %vm655_vm1 = vcmask 1022976  }
  0xca   : > { %528 = vst.msk [vmem:[#allocation2 + $0x18] sm:$0xff] %vm504_vm0, %v518_v27  ;;  %vm633_vm0 = vcmask 1031168  }
  0xcb   : > { %v539_v30 = vpop.permute.xlu0 %538 }
  0xcc   : > { %548 = vst.msk [vmem:[#allocation2 + $0x8] sm:$0xff] %vm547_vm2, %v539_v30  ;;  %v541_v31 = vpop.permute.xlu1 %540  ;;  %v566_v34 = vld [vmem:[#allocation2] sm:$0xff] }
  0xcd   : > { %549 = vst.msk [vmem:[#allocation2 + $0x18] sm:$0xff] %vm547_vm2, %v541_v31  ;;  %v576_v39 = vsel %vm1903_vm9, %v566_v34, 0.0  ;;  %vm677_vm2 = vcmask 1014784  }
  0xce   : > { %v589_v48 = vrot.slane %v576_v39, 4 }
  0xcf   : > { %v500_v32 = vpop.permute.xlu0 %499 }
  0xd0   : > { %508 = vst.msk [vmem:[#allocation2 + $0x20] sm:$0xf] %vm507_vm5, %v500_v32  ;;  %v520_v35 = vpop.permute.xlu1 %519  ;;  %v568_v36 = vld [vmem:[#allocation2 + $0x10] sm:$0xff] }
  0xd1   : > { %530 = vst.msk [vmem:[#allocation2 + $0x20] sm:$0xf] %vm529_vm6, %v520_v35  ;;  %v578_v38 = vsel %vm1903_vm9, %v568_v36, 0.0  ;;  %v1301_v50 = vpack.c.bf16 %v568_v36, %v566_v34 }
  0xd2   : > { %531 = vst.msk [vmem:[#allocation2 + $0x28] sm:$0xf] %vm507_vm5, %v520_v35  ;;  %v591_v44 = vrot.slane %v578_v38, 4  ;;  %vm837_vm5 = vcmp.lt.s32.totalorder %v1898_v18, 300 }
  0xd3   : > { %v543_v40 = vpop.permute.xlu0 %542  ;;  %v567_v41 = vld [vmem:[#allocation2 + $0x8] sm:$0xff]  ;;  %vm1998_vm8 = vmand %vm835_vm4, %vm837_vm5 }
  0xd4   : > { %551 = vst.msk [vmem:[#allocation2 + $0x28] sm:$0xf] %vm550_vm10, %v543_v40  ;;  %v569_v42 = vld [vmem:[#allocation2 + $0x18] sm:$0xff]  ;;  %v577_v43 = vsel %vm1907_vm11, %v567_v41, 0.0  ;;  %v592_v52 = vsel %vm588_vm13, %v589_v48, %v591_v44  ;;  %vm1326_vm10 = vmpackc.low %vm1998_vm8, %vm1998_vm8 }
  0xd5   : > { %v579_v45 = vsel %vm1907_vm11, %v569_v42, 0.0  ;;  %v590_v46 = vrot.slane %v577_v43, 4  ;;  %v1298_v47 = vpack.c.bf16 %v569_v42, %v567_v41  ;;  %v1472_v60 = vpack.i.bf16 %v577_v43, %v576_v39 }
  0xd6   : > { %v593_v49 = vrot.slane %v579_v45, 4  ;;  %v1492_v2 = vpack.i.bf16 %v579_v45, %v578_v38 }
  0xd7   : > { %1300 = vmatprep.subr.msk.bf16.mxu0 %vm1299_vm12, %v1298_v47  ;;  %v1462_v51 = vpack.i.bf16 %v590_v46, %v589_v48 }
  0xd8   : > { %1303 = vmatpush1.bf16.msk.msra.mxu0 %vm1302_vm14, %v1301_v50  ;;  %v594_v53 = vsel %vm588_vm13, %v590_v46, %v593_v49  ;;  %v570_v54 = vld [vmem:[#allocation2 + $0x20] sm:$0xf] }
  0xd9   : > { %1463 = vrot.lane.b32.xlu1 %v1462_v51, %s1688_s5  ;;  %v1467_v55 = vpack.i.bf16 %v594_v53, %v592_v52  ;;  %v580_v56 = vsel %vm1903_vm9, %v570_v54, 0.0 }
  0xda   : > { %v595_v58 = vrot.slane %v580_v56, 4 }
  0xdb   : > { %1468 = vrot.lane.b32.xlu0 %v1467_v55, %s1688_s5  ;;  %v571_v57 = vld [vmem:[#allocation2 + $0x28] sm:$0xf] }
  0xdc   : > { %v581_v59 = vsel %vm1907_vm11, %v571_v57, 0.0  ;;  %v596_v63 = vsel %vm588_vm13, %v591_v44, %v595_v58  ;;  %vm989_vm11 = vcmask 261120  }
  0xdd   : > { %v1477_v61 = vpack.i.bf16 %v581_v59, %v580_v56  ;;  %v597_v62 = vrot.slane %v581_v59, 4 }
  0xdf   : > { %1473 = vrot.lane.b32.xlu0 %v1472_v60, %s1689_s23  ;;  %1478 = vrot.lane.b32.xlu1 %v1477_v61, %s1689_s23  ;;  %v598_v0 = vsel %vm588_vm13, %v593_v49, %v597_v62 }
  0xe0   : > { %v1487_v1 = vpack.i.bf16 %v598_v0, %v596_v63 }
  0xe3   : > { %1483 = vrot.lane.b32.xlu0 %v1462_v51, %s1690_s15  ;;  %1488 = vrot.lane.b32.xlu1 %v1487_v1, %s1688_s5 }
  0xe7   : > { %1498 = vrot.lane.b32.xlu0 %v1467_v55, %s1690_s15  ;;  %1493 = vrot.lane.b32.xlu1 %v1492_v2, %s1689_s23 }
  0xeb   : > { %1503 = vrot.lane.b32.xlu0 %v1472_v60, %s1691_s22  ;;  %1508 = vrot.lane.b32.xlu1 %v1487_v1, %s1690_s15 }
  0xef   : > { %673 = vrot.lane.b32.xlu0 %v580_v56, %s1691_s22  ;;  %1513 = vrot.lane.b32.xlu1 %v1492_v2, %s1691_s22 }
  0xf3   : > { %675 = vrot.lane.b32.xlu1 %v581_v59, %s1691_s22  ;;  %699 = vperm.xlu0 %1517, %v693_v4  }
  0xf7   : > { %704 = vperm.xlu1 %1518, %v694_v5   ;;  %714 = vperm.xlu0 %1517, %v696_v8  }
  0xfb   : > { %709 = vperm.xlu1 %1518, %v695_v7  }
 0x14b   : > { %v1464_v9 = vpop.permute.xlu1 %1463 }
 0x14c   : > { %v1466_v10 = vunpack.i.h.bf16 %v1464_v9  ;;  %v1465_v11 = vunpack.i.l.bf16 %v1464_v9  ;;  %v689_v9 = vld [vmem:[%s2161_s3] sm:$0xff] }
 0x14d   : > { %v1469_v12 = vpop.permute.xlu0 %1468 }
 0x14e   : > { %v612_v13 = vsel %vm611_vm15, %v1465_v11, %v1466_v10  ;;  %v1471_v14 = vunpack.i.h.bf16 %v1469_v12  ;;  %v1470_v15 = vunpack.i.l.bf16 %v1469_v12  ;;  %v686_v16 = vsel %vm588_vm13, %v581_v59, %v1466_v10  ;;  %v690_v11 = vld [vmem:[%s2161_s3 + $0x8] sm:$0xff]  ;;  %v691_v12 = vld [vmem:[%s2161_s3 + $0x10] sm:$0xff] }
 0x14f   : > { %v685_v19 = vsel %vm588_vm13, %v580_v56, %v612_v13  ;;  %v692_v13 = vld [vmem:[%s2161_s3 + $0x18] sm:$0xff] }
 0x150   : > { %v1304_v20 = vpack.c.bf16 %v1471_v14, %v686_v16  ;;  %v613_v21 = vsel %vm611_vm15, %v1470_v15, %v1471_v14  ;;  %v1694_v14 = vmov 0.0|0.0   ;;  %v834_v15 = vadd.s32 %v832_v17, %v1900_v25 }
 0x151   : > { %v1474_v22 = vpop.permute.xlu0 %1473  ;;  %v1479_v23 = vpop.permute.xlu1 %1478  ;;  %v1306_v24 = vpack.c.bf16 %v613_v21, %v685_v19  ;;  %1324 = vmatprep.subr.bf16.mxu1 %v1694_v14 }
 0x152   : > { %1305 = vmatprep.subr.bf16.mxu0 %v1304_v20  ;;  %v1476_v26 = vunpack.i.h.bf16 %v1474_v22  ;;  %v1475_v27 = vunpack.i.l.bf16 %v1474_v22  ;;  %v1481_v34 = vunpack.i.h.bf16 %v1479_v23  ;;  %v1480_v35 = vunpack.i.l.bf16 %v1479_v23 }
 0x153   : > { %1307 = vmatpush1.bf16.msra.mxu0 %v1306_v24  ;;  %vm836_vm6 = vcmp.ge.s32.totalorder %v834_v15, 0  ;;  %vm838_vm7 = vcmp.lt.s32.totalorder %v834_v15, 300 }
 0x154   : > { %v634_v38 = vsel %vm633_vm0, %v1475_v27, %v1476_v26  ;;  %v636_v45 = vsel %vm633_vm0, %v1480_v35, %v1481_v34  ;;  %vm2002_vm9 = vmand %vm836_vm6, %vm838_vm7 }
 0x155   : > { %v1484_v28 = vpop.permute.xlu0 %1483  ;;  %v1489_v29 = vpop.permute.xlu1 %1488 }
 0x156   : > { %v1486_v30 = vunpack.i.h.bf16 %v1484_v28  ;;  %v1485_v31 = vunpack.i.l.bf16 %v1484_v28  ;;  %v1491_v32 = vunpack.i.h.bf16 %v1489_v29  ;;  %v1490_v33 = vunpack.i.l.bf16 %v1489_v29 }
 0x158   : > { %v1308_v36 = vpack.c.bf16 %v1476_v26, %v1491_v32  ;;  %v614_v37 = vsel %vm611_vm15, %v1490_v33, %v1491_v32  ;;  %v656_v39 = vsel %vm655_vm1, %v1485_v31, %v1486_v30  ;;  %v688_v48 = vsel %vm588_vm13, %v1481_v34, %v1486_v30 }
 0x159   : > { %v1499_v40 = vpop.permute.xlu0 %1498  ;;  %v1494_v41 = vpop.permute.xlu1 %1493  ;;  %v1310_v42 = vpack.c.bf16 %v634_v38, %v614_v37  ;;  %v687_v51 = vsel %vm588_vm13, %v636_v45, %v656_v39 }
 0x15a   : > { %v1496_v43 = vunpack.i.h.bf16 %v1494_v41  ;;  %v1495_v44 = vunpack.i.l.bf16 %v1494_v41  ;;  %1309 = vmatprep.subr.bf16.mxu0 %v1308_v36  ;;  %v1501_v46 = vunpack.i.h.bf16 %v1499_v40  ;;  %v1500_v47 = vunpack.i.l.bf16 %v1499_v40 }
 0x15b   : > { %1311 = vmatpush1.bf16.msra.mxu0 %v1310_v42 }
 0x15c   : > { %v1312_v49 = vpack.c.bf16 %v688_v48, %v1496_v43  ;;  %v635_v50 = vsel %vm633_vm0, %v1495_v44, %v1496_v43  ;;  %v657_v57 = vsel %vm655_vm1, %v1500_v47, %v1501_v46 }
 0x15d   : > { %v1504_v52 = vpop.permute.xlu0 %1503  ;;  %v1509_v53 = vpop.permute.xlu1 %1508  ;;  %v1314_v54 = vpack.c.bf16 %v687_v51, %v635_v50 }
 0x15e   : > { %v1511_v55 = vunpack.i.h.bf16 %v1509_v53  ;;  %v1510_v56 = vunpack.i.l.bf16 %v1509_v53  ;;  %1313 = vmatprep.subr.bf16.mxu0 %v1312_v49  ;;  %v1506_v58 = vunpack.i.h.bf16 %v1504_v52  ;;  %v1505_v59 = vunpack.i.l.bf16 %v1504_v52 }
 0x15f   : > { %1315 = vmatpush1.bf16.msra.mxu0 %v1314_v54 }
 0x160   : > { %v1316_v60 = vpack.c.bf16 %v1511_v55, %v1501_v46  ;;  %v658_v61 = vsel %vm655_vm1, %v1510_v56, %v1511_v55  ;;  %v678_v4 = vsel %vm677_vm2, %v1505_v59, %v1506_v58  ;;  %v958_v59 = vld [vmem:[%s2193_s18 + $0x8] sm:$0xff] }
 0x161   : > { %v1514_v62 = vpop.permute.xlu1 %1513  ;;  %v1318_v63 = vpack.c.bf16 %v658_v61, %v657_v57  ;;  %v674_v8 = vpop.permute.xlu0 %673  ;;  %1290 = vmatprep.mubr.msk.f32.mxu1 %vm989_vm11, %v958_v59  ;;  %v966_v61 = vld [vmem:[%s2194_s12 + $0x8] sm:$0xff] }
 0x162   : > { %v1516_v0 = vunpack.i.h.bf16 %v1514_v62  ;;  %v1515_v1 = vunpack.i.l.bf16 %v1514_v62  ;;  %1317 = vmatprep.subr.bf16.mxu0 %v1316_v60  ;;  %v965_v60 = vld [vmem:[%s2194_s12] sm:$0xff]  ;;  %v967_v62 = vld [vmem:[%s2194_s12 + $0x10] sm:$0xff] }
 0x163   : > { %1319 = vmatpush1.bf16.msra.mxu0 %v1318_v63  ;;  %v968_v63 = vld [vmem:[%s2194_s12 + $0x18] sm:$0xff] }
 0x164   : > { %v1320_v2 = vpack.c.bf16 %v1516_v0, %v1506_v58  ;;  %v679_v5 = vsel %vm677_vm2, %v1515_v1, %v1516_v0 }
 0x165   : > { %v1322_v6 = vpack.c.bf16 %v679_v5, %v678_v4  ;;  %v676_v7 = vpop.permute.xlu1 %675 }
 0x166   : > { %1321 = vmatprep.subr.bf16.mxu0 %v1320_v2  ;;  %v680_v10 = vsel %vm677_vm2, %v674_v8, %v676_v7 }
 0x167   : > { %1323 = vmatpush1.bf16.msra.mxu0 %v1322_v6 }
 0x168   : > { %1280 = vmatprep.subr.msk.mxu0 %vm588_vm13, %v676_v7 }
 0x16b   : > { %1281 = vmatpush1.msk.msra.mxu0 %vm588_vm13, %v680_v10 }
 0x16c   : > { %1282 = vmatmul.mubr.msk.f32.vlgmr.msra.gmra.mrb[0].mxu0 %vm717_vm3, %v689_v9 }
 0x16d   : > { %804 = vmatprep.mubr.f32.mxu0 %v1692_v3 }
 0x170   : > { %1283 = vmatmul.mubr.msk.f32.gmra.mrb[2].mxu0 %vm717_vm3, %v690_v11 }
 0x171   : > { %810 = vmatprep.mubr.f32.mxu0 %v1692_v3 }
 0x172   : > { %v700_v16 = vpop.permute.xlu0 %699 }
 0x174   : > { %1284 = vmatmul.mubr.msk.f32.gmra.mrb[4].mxu0 %vm717_vm3, %v691_v12 }
 0x175   : > { %816 = vmatprep.mubr.f32.mxu0 %v1692_v3 }
 0x176   : > { %v705_v3 = vpop.permute.xlu1 %704  ;;  %v715_v44 = vpop.permute.xlu0 %714 }
 0x178   : > { %1285 = vmatmul.mubr.msk.f32.gmra.mrb[6].mxu0 %vm717_vm3, %v692_v13 }
 0x17a   : > { %v710_v31 = vpop.permute.xlu1 %709 }
 0x23f   : > { %v800_v19 = vpop.f32.mrb[0].mxu0 }
 0x240   : > { %v801_v20 = vadd.f32 %v800_v19, %v700_v16  ;;  %v802_v21 = vpop.f32.mrb[1].mxu0 }
 0x241   : > { %v803_v23 = vadd.f32 %v802_v21, %v700_v16 }
 0x242   : > { %v823_v24 = vmax.f32 %v801_v20, 0.0 }
 0x243   : > { %v824_v17 = vmax.f32 %v803_v23, 0.0  ;;  %v806_v25 = vpop.f32.mrb[2].mxu0 }
 0x244   : > { %v845_v18 = vsel %vm1998_vm8, %v823_v24, 0.0  ;;  %v807_v27 = vadd.f32 %v806_v25, %v705_v3  ;;  %v808_v28 = vpop.f32.mrb[3].mxu0 }
 0x245   : > { %v846_v29 = vsel %vm2002_vm9, %v824_v17, 0.0  ;;  %v809_v30 = vadd.f32 %v808_v28, %v705_v3 }
 0x246   : > { %v825_v32 = vmax.f32 %v807_v27, 0.0  ;;  %v1519_v33 = vpack.i.bf16 %v846_v29, %v845_v18 }
 0x247   : > { %v826_v34 = vmax.f32 %v809_v30, 0.0  ;;  %v812_v35 = vpop.f32.mrb[4].mxu0 }
 0x248   : > { %v847_v36 = vsel %vm1998_vm8, %v825_v32, 0.0  ;;  %v1325_v37 = vpack.c.bf16 %v825_v32, %v823_v24  ;;  %v813_v38 = vadd.f32 %v812_v35, %v710_v31  ;;  %v814_v39 = vpop.f32.mrb[5].mxu0  ;;  %1520 = vrot.lane.b32.xlu1 %v1519_v33, %s1688_s5 }
 0x249   : > { %v848_v40 = vsel %vm2002_vm9, %v826_v34, 0.0  ;;  %v815_v41 = vadd.f32 %v814_v39, %v710_v31 }
 0x24a   : > { %v827_v42 = vmax.f32 %v813_v38, 0.0  ;;  %1327 = vmatpush1.bf16.msk.msra.mxu1 %vm1326_vm10, %v1325_v37  ;;  %v1524_v43 = vpack.i.bf16 %v848_v40, %v847_v36 }
 0x24b   : > { %v828_v45 = vmax.f32 %v815_v41, 0.0  ;;  %v818_v46 = vpop.f32.mrb[6].mxu0  ;;  %1328 = vmatprep.subr.bf16.mxu1 %v1694_v14 }
 0x24c   : > { %v849_v47 = vsel %vm1998_vm8, %v827_v42, 0.0  ;;  %v819_v48 = vadd.f32 %v818_v46, %v715_v44  ;;  %v820_v49 = vpop.f32.mrb[7].mxu0  ;;  %1525 = vrot.lane.b32.xlu0 %v1524_v43, %s1688_s5 }
 0x24d   : > { %v850_v50 = vsel %vm2002_vm9, %v828_v45, 0.0  ;;  %v821_v51 = vadd.f32 %v820_v49, %v715_v44 }
 0x24e   : > { %v829_v52 = vmax.f32 %v819_v48, 0.0  ;;  %v1529_v53 = vpack.i.bf16 %v850_v50, %v849_v47 }
 0x24f   : > { %v830_v54 = vmax.f32 %v821_v51, 0.0 }
 0x250   : > { %v851_v55 = vsel %vm1998_vm8, %v829_v52, 0.0  ;;  %v1329_v56 = vpack.c.bf16 %v829_v52, %v827_v42  ;;  %1530 = vrot.lane.b32.xlu1 %v1529_v53, %s1688_s5 }
 0x251   : > { %v852_v57 = vsel %vm2002_vm9, %v830_v54, 0.0 }
 0x252   : > { %1331 = vmatpush1.bf16.msk.msra.mxu1 %vm1326_vm10, %v1329_v56  ;;  %v1539_v58 = vpack.i.bf16 %v852_v57, %v851_v55 }
 0x253   : > { %1332 = vmatprep.subr.bf16.mxu1 %v1694_v14 }
 0x254   : > { %1540 = vrot.lane.b32.xlu0 %v1539_v58, %s1688_s5  ;;  %1535 = vrot.lane.b32.xlu1 %v1519_v33, %s1689_s23 }
 0x258   : > { %1545 = vrot.lane.b32.xlu0 %v1524_v43, %s1689_s23  ;;  %1550 = vrot.lane.b32.xlu1 %v1529_v53, %s1689_s23 }
 0x25c   : > { %1560 = vrot.lane.b32.xlu0 %v1539_v58, %s1689_s23  ;;  %1555 = vrot.lane.b32.xlu1 %v1519_v33, %s1690_s15 }
 0x260   : > { %1565 = vrot.lane.b32.xlu0 %v1524_v43, %s1690_s15  ;;  %1570 = vrot.lane.b32.xlu1 %v1529_v53, %s1690_s15 }
 0x264   : > { %1580 = vrot.lane.b32.xlu0 %v1539_v58, %s1690_s15  ;;  %1575 = vrot.lane.b32.xlu1 %v1519_v33, %s1691_s22 }
 0x268   : > { %1585 = vrot.lane.b32.xlu0 %v1524_v43, %s1691_s22  ;;  %1590 = vrot.lane.b32.xlu1 %v1529_v53, %s1691_s22 }
 0x26c   : > { %1595 = vrot.lane.b32.xlu0 %v1539_v58, %s1691_s22  ;;  %971 = vperm.xlu1 %1518, %v965_v60   ;;  %s1273_s22 = sshll.u32 %s431_s8, 5  ;;  %s2196_s8 = sld [smem:[#allocation7_spill]] (%p1851_p5) }
 0x26d   : > { %s482_s14 = scalar_lea.vmem [#allocation6], %s1273_s22 }
 0x270   : > { %976 = vperm.xlu0 %1517, %v966_v61   ;;  %981 = vperm.xlu1 %1518, %v967_v62  }
 0x272   : > { %s1365_s20 = smul.u32 (%p1851_p5), 12, %s2196_s8 }
 0x274   : > { %986 = vperm.xlu0 %1517, %v968_v63   ;;  %s1103_s6 = sadd.s32 (%p1851_p5), %s1669_s30, %s1365_s20 }
 0x275   : > { %s1295_s19 = sshll.u32 (%p1851_p5), %s1103_s6, 3 }
 0x276   : > { %s1105_s15 = scalar_lea.vmem (%p1851_p5), %s2197_s17, %s1295_s19 }
 0x2ba   : > { %v1521_v0 = vpop.permute.xlu1 %1520 }
 0x2bb   : > { %v1523_v1 = vunpack.i.h.bf16 %v1521_v0  ;;  %v1522_v2 = vunpack.i.l.bf16 %v1521_v0 }
 0x2bd   : > { %v877_v7 = vsel %vm611_vm15, %v1522_v2, %v1523_v1 }
 0x2be   : > { %v1526_v4 = vpop.permute.xlu0 %1525 }
 0x2bf   : > { %v1528_v5 = vunpack.i.h.bf16 %v1526_v4  ;;  %v1527_v6 = vunpack.i.l.bf16 %v1526_v4 }
 0x2c1   : > { %v878_v8 = vsel %vm611_vm15, %v1527_v6, %v1528_v5 }
 0x2c2   : > { %v1531_v9 = vpop.permute.xlu1 %1530  ;;  %v1333_v10 = vpack.c.bf16 %v878_v8, %v877_v7 }
 0x2c3   : > { %v1533_v11 = vunpack.i.h.bf16 %v1531_v9  ;;  %v1532_v12 = vunpack.i.l.bf16 %v1531_v9 }
 0x2c4   : > { %1334 = vmatpush1.bf16.msra.mxu1 %v1333_v10  ;;  %v957_v10 = vld [vmem:[%s2193_s18] sm:$0xff] }
 0x2c5   : > { %1335 = vmatprep.subr.bf16.mxu1 %v1694_v14  ;;  %v879_v21 = vsel %vm611_vm15, %v1532_v12, %v1533_v11  ;;  %v960_v11 = vld [vmem:[%s2193_s18 + $0x18] sm:$0xff]  ;;  %v962_v12 = vld [vmem:[%s2193_s18 + $0x28] sm:$0xff] }
 0x2c6   : > { %v1541_v13 = vpop.permute.xlu0 %1540  ;;  %v1536_v15 = vpop.permute.xlu1 %1535 }
 0x2c7   : > { %v1543_v16 = vunpack.i.h.bf16 %v1541_v13  ;;  %v1542_v19 = vunpack.i.l.bf16 %v1541_v13  ;;  %v1538_v3 = vunpack.i.h.bf16 %v1536_v15  ;;  %v1537_v20 = vunpack.i.l.bf16 %v1536_v15  ;;  %v961_v13 = vld [vmem:[%s2193_s18 + $0x20] sm:$0xff]  ;;  %v964_v15 = vld [vmem:[%s2193_s18 + $0x38] sm:$0xff] }
 0x2c9   : > { %v880_v22 = vsel %vm611_vm15, %v1542_v19, %v1543_v16  ;;  %v901_v28 = vsel %vm633_vm0, %v1537_v20, %v1538_v3  ;;  %v963_v16 = vld [vmem:[%s2193_s18 + $0x30] sm:$0xff] }
 0x2ca   : > { %v1546_v23 = vpop.permute.xlu0 %1545  ;;  %v1551_v24 = vpop.permute.xlu1 %1550  ;;  %v1336_v26 = vpack.c.bf16 %v880_v22, %v879_v21 }
 0x2cb   : > { %v1548_v17 = vunpack.i.h.bf16 %v1546_v23  ;;  %v1547_v25 = vunpack.i.l.bf16 %v1546_v23  ;;  %v1553_v18 = vunpack.i.h.bf16 %v1551_v24  ;;  %v1552_v27 = vunpack.i.l.bf16 %v1551_v24 }
 0x2cc   : > { %1337 = vmatpush1.bf16.msra.mxu1 %v1336_v26 }
 0x2cd   : > { %1338 = vmatprep.subr.bf16.mxu1 %v1694_v14  ;;  %v902_v29 = vsel %vm633_vm0, %v1547_v25, %v1548_v17  ;;  %v903_v37 = vsel %vm633_vm0, %v1552_v27, %v1553_v18 }
 0x2ce   : > { %v1561_v30 = vpop.permute.xlu0 %1560  ;;  %v1556_v31 = vpop.permute.xlu1 %1555  ;;  %v1339_v32 = vpack.c.bf16 %v902_v29, %v901_v28 }
 0x2cf   : > { %v1563_v33 = vunpack.i.h.bf16 %v1561_v30  ;;  %v1562_v34 = vunpack.i.l.bf16 %v1561_v30  ;;  %v1558_v35 = vunpack.i.h.bf16 %v1556_v31  ;;  %v1557_v36 = vunpack.i.l.bf16 %v1556_v31 }
 0x2d0   : > { %1340 = vmatpush1.bf16.msra.mxu1 %v1339_v32 }
 0x2d1   : > { %1341 = vmatprep.subr.bf16.mxu1 %v1694_v14  ;;  %v904_v38 = vsel %vm633_vm0, %v1562_v34, %v1563_v33  ;;  %v925_v46 = vsel %vm655_vm1, %v1557_v36, %v1558_v35 }
 0x2d2   : > { %v1566_v39 = vpop.permute.xlu0 %1565  ;;  %v1571_v40 = vpop.permute.xlu1 %1570  ;;  %v1342_v41 = vpack.c.bf16 %v904_v38, %v903_v37 }
 0x2d3   : > { %v1568_v42 = vunpack.i.h.bf16 %v1566_v39  ;;  %v1567_v43 = vunpack.i.l.bf16 %v1566_v39  ;;  %v1573_v44 = vunpack.i.h.bf16 %v1571_v40  ;;  %v1572_v45 = vunpack.i.l.bf16 %v1571_v40 }
 0x2d4   : > { %1343 = vmatpush1.bf16.msra.mxu1 %v1342_v41 }
 0x2d5   : > { %1344 = vmatprep.subr.bf16.mxu1 %v1694_v14  ;;  %v926_v47 = vsel %vm655_vm1, %v1567_v43, %v1568_v42  ;;  %v927_v55 = vsel %vm655_vm1, %v1572_v45, %v1573_v44 }
 0x2d6   : > { %v1581_v48 = vpop.permute.xlu0 %1580  ;;  %v1576_v49 = vpop.permute.xlu1 %1575  ;;  %v1345_v50 = vpack.c.bf16 %v926_v47, %v925_v46 }
 0x2d7   : > { %v1583_v51 = vunpack.i.h.bf16 %v1581_v48  ;;  %v1582_v52 = vunpack.i.l.bf16 %v1581_v48  ;;  %v1578_v53 = vunpack.i.h.bf16 %v1576_v49  ;;  %v1577_v54 = vunpack.i.l.bf16 %v1576_v49 }
 0x2d8   : > { %1346 = vmatpush1.bf16.msra.mxu1 %v1345_v50 }
 0x2d9   : > { %1347 = vmatprep.subr.bf16.mxu1 %v1694_v14  ;;  %v928_v56 = vsel %vm655_vm1, %v1582_v52, %v1583_v51  ;;  %v949_v0 = vsel %vm677_vm2, %v1577_v54, %v1578_v53 }
 0x2da   : > { %v1586_v57 = vpop.permute.xlu0 %1585  ;;  %v1591_v58 = vpop.permute.xlu1 %1590  ;;  %v1348_v59 = vpack.c.bf16 %v928_v56, %v927_v55 }
 0x2db   : > { %v1588_v60 = vunpack.i.h.bf16 %v1586_v57  ;;  %v1587_v61 = vunpack.i.l.bf16 %v1586_v57  ;;  %v1593_v62 = vunpack.i.h.bf16 %v1591_v58  ;;  %v1592_v63 = vunpack.i.l.bf16 %v1591_v58 }
 0x2dc   : > { %1349 = vmatpush1.bf16.msra.mxu1 %v1348_v59 }
 0x2dd   : > { %1350 = vmatprep.subr.bf16.mxu1 %v1694_v14  ;;  %v950_v1 = vsel %vm677_vm2, %v1587_v61, %v1588_v60  ;;  %v951_v7 = vsel %vm677_vm2, %v1592_v63, %v1593_v62 }
 0x2de   : > { %v1596_v2 = vpop.permute.xlu0 %1595  ;;  %v1351_v4 = vpack.c.bf16 %v950_v1, %v949_v0 }
 0x2df   : > { %v1598_v5 = vunpack.i.h.bf16 %v1596_v2  ;;  %v1597_v6 = vunpack.i.l.bf16 %v1596_v2 }
 0x2e0   : > { %1352 = vmatpush1.bf16.msra.mxu1 %v1351_v4 }
 0x2e1   : > { %1353 = vmatprep.subr.bf16.mxu1 %v1694_v14  ;;  %v952_v8 = vsel %vm677_vm2, %v1597_v6, %v1598_v5  ;;  %v959_v14 = vld [vmem:[%s2193_s18 + $0x10] sm:$0xff] }
 0x2e2   : > { %v1354_v9 = vpack.c.bf16 %v952_v8, %v951_v7 }
 0x2e4   : > { %1355 = vmatpush1.bf16.msra.mxu1 %v1354_v9 }
 0x2e7   : > { %1067 = vmatmul.mubr.f32.vlgmr.msra.gmra.mrb[0].mxu1 %v957_v10 }
 0x2e8   : > { %1291 = vmatprep.mubr.msk.f32.mxu1 %vm989_vm11, %v960_v11 }
 0x2eb   : > { %1072 = vmatmul.mubr.f32.gmra.mrb[2].mxu1 %v959_v14  ;;  %v972_v19 = vpop.permute.xlu1 %971 }
 0x2ec   : > { %1292 = vmatprep.mubr.msk.f32.mxu1 %vm989_vm11, %v962_v12 }
 0x2ef   : > { %1077 = vmatmul.mubr.f32.gmra.mrb[4].mxu1 %v961_v13  ;;  %v977_v23 = vpop.permute.xlu0 %976  ;;  %v982_v18 = vpop.permute.xlu1 %981 }
 0x2f0   : > { %1293 = vmatprep.mubr.msk.f32.mxu1 %vm989_vm11, %v964_v15 }
 0x2f3   : > { %1082 = vmatmul.mubr.f32.gmra.mrb[6].mxu1 %v963_v16  ;;  %v987_v31 = vpop.permute.xlu0 %986 }
 0x3ba   : > { %v1068_v3 = vpop.f32.mrb[0].mxu1 }
 0x3bb   : > { %v1069_v20 = vadd.f32 %v1068_v3, %v972_v19  ;;  %v1070_v21 = vpop.f32.mrb[1].mxu1 }
 0x3bd   : > { %v1087_v22 = vmax.f32 %v1069_v20, 0.0 }
 0x3be   : > { %v1073_v24 = vpop.f32.mrb[2].mxu1 }
 0x3bf   : > { %1091 = vst [vmem:[%s482_s14] sm:$0xff] %v1087_v22  ;;  %v1074_v26 = vadd.f32 %v1073_v24, %v977_v23  ;;  %v1075_v17 = vpop.f32.mrb[3].mxu1 }
 0x3c1   : > { %v1088_v25 = vmax.f32 %v1074_v26, 0.0 }
 0x3c2   : > { %v1078_v27 = vpop.f32.mrb[4].mxu1 }
 0x3c3   : > { %1092 = vst [vmem:[%s482_s14 + $0x8] sm:$0xff] %v1088_v25  ;;  %v1079_v28 = vadd.f32 %v1078_v27, %v982_v18  ;;  %v1080_v29 = vpop.f32.mrb[5].mxu1 }
 0x3c5   : > { %v1089_v30 = vmax.f32 %v1079_v28, 0.0  ;;  %1101 = sbr.rel (!%p1851_p5) target bundleno = 980 (0x3d4), region = 166 }
 0x3c6   : > { %v1083_v32 = vpop.f32.mrb[6].mxu1  ;;  %v1139_v36 = vld [vmem:[%s482_s14] sm:$0xff] (%p1851_p5) }
 0x3c7   : > { %1093 = vst [vmem:[%s482_s14 + $0x10] sm:$0xff] %v1089_v30  ;;  %v1084_v33 = vadd.f32 %v1083_v32, %v987_v31  ;;  %v1085_v34 = vpop.f32.mrb[7].mxu1  ;;  %1140 = vst [vmem:[%s1105_s15] sm:$0xff] (%p1851_p5), %v1139_v36 }
 0x3c9   : > { %v1090_v35 = vmax.f32 %v1084_v33, 0.0 }
 0x3ca   : > { %v1141_v37 = vld [vmem:[%s482_s14 + $0x8] sm:$0xff] (%p1851_p5) }
 0x3cb   : > { %1094 = vst [vmem:[%s482_s14 + $0x18] sm:$0xff] %v1090_v35  ;;  %1142 = vst [vmem:[%s1105_s15 + $0x18] sm:$0xff] (%p1851_p5), %v1141_v37 }
 0x3ce   : > { %v1143_v38 = vld [vmem:[%s482_s14 + $0x10] sm:$0xff] }
 0x3cf   : > { %1144 = vst [vmem:[%s1105_s15 + $0x30] sm:$0xff] %v1143_v38 }
 0x3d2   : > { %v1145_v39 = vld [vmem:[%s482_s14 + $0x18] sm:$0xff] }
 0x3d3   : > { %1146 = vst [vmem:[%s1105_s15 + $0x48] sm:$0xff] %v1145_v39 }
 0x3d4 PF: > { %s17_s11 = sadd.s32 1, %s1685_s11   ;;  %s2198_s30 = sld [smem:[#allocation11_spill]] }
 0x3d5   : > { %p14_p8 = scmp.ge.s32.totalorder %s17_s11, 8   ;;  %s2199_s21 = sld [smem:[#allocation10_spill]] }
 0x3d6   : > { %s2200_s13 = sld [smem:[#allocation8_spill]]  ;;  %s2201_s7 = sld [smem:[#allocation9_spill]] }
 0x3d7   : > { %s2202_s24 = smov %s1649_s25  ;;  %s2203_s25 = smov %s1858_s16 }
 0x3d8   : > { %s2204_s26 = smov %s1657_s27  ;;  %s2206_s28 = smov %s1665_s29 }
 0x3d9   : > { %s2209_s8 = smov %s1681_s10  ;;  %16 = sbr.rel (!%p14_p8) target bundleno = 10 (0xa), region = 251 }
 0x3da   : > { %s2205_s27 = smov %s2198_s30  ;;  %s2208_s30 = smov %s1677_s9 }
 0x3db   : > { %s2207_s29 = smov %s2199_s21 }
 0x3dc   : > { %s2210_s9 = smov %s2200_s13  ;;  %s2211_s10 = smov %s2201_s7 }

// kernel: eegcnn_forward.3
= control target key start
LH: loop header
LB: loop body
LE: loop exit
PB: predicated region body
PF: predicated region fallthrough
CT: control target
= control target key end

     0   :  { %v170_v3 = vlaneseq  ;;  %v4112_v7 = vmov 1983009808   ;;  %s4563_s0 = inlined_call_operand.vmem [shape: f32[2,12288], index: 0, kind: input, shape index: {}]   ;;  %s4564_s1 = inlined_call_operand.vmem [shape: f32[6,12288], index: 1, kind: input, shape index: {}]   ;;  %s4565_s2 = inlined_call_operand.vmem [shape: f32[1,6], index: 2, kind: input, shape index: {}]   ;;  %s4566_s3 = inlined_call_operand.hbm [shape: f32[2,6], index: 3, kind: output, shape index: {}]  }
   0x1   :  { %v47_v0 = vld [vmem:[%s4564_s1 + $0x8] sm:$0x3f]  ;;  %v46_v1 = vld [vmem:[%s4564_s1] sm:$0x3f]  ;;  %v49_v2 = vld [vmem:[%s4564_s1 + $0x18] sm:$0x3f]  ;;  %v168_v8 = vunpack.c.l.s4 %v4112_v7 }
   0x2   :  { %670 = vmatprep.subr.mxu0 %v47_v0  ;;  %740 = vmatprep.subr.mxu1 %v49_v2  ;;  %v48_v4 = vld [vmem:[%s4564_s1 + $0x10] sm:$0x3f]  ;;  %v22_v5 = vld [vmem:[%s4563_s0] sm:$0xff]  ;;  %v23_v6 = vld [vmem:[%s4563_s0 + $0x8] sm:$0xff]  ;;  %v171_v9 = vshrl.u32 %v170_v3, 7 }
   0x3   :  { %671 = vmatpush1.xpose.msra.mxu0 %v46_v1  ;;  %741 = vmatpush1.xpose.msra.mxu1 %v48_v4  ;;  %v51_v10 = vld [vmem:[%s4564_s1 + $0x28] sm:$0x3f]  ;;  %v53_v11 = vld [vmem:[%s4564_s1 + $0x38] sm:$0x3f]  ;;  %v169_v12 = vunpack.c.0.s8 %v168_v8  ;;  %v166_v13 = vcombine.high %v22_v5, %v22_v5  ;;  %v183_v14 = vcombine.high %v23_v6, %v23_v6  ;;  %v24_v15 = vld [vmem:[%s4563_s0 + $0x10] sm:$0xff] }
   0x4   :  { %810 = vmatprep.subr.mxu0 %v51_v10  ;;  %880 = vmatprep.subr.mxu1 %v53_v11  ;;  %v200_v17 = vcombine.high %v24_v15, %v24_v15  ;;  %v25_v22 = vld [vmem:[%s4563_s0 + $0x18] sm:$0xff]  ;;  %v50_v25 = vld [vmem:[%s4564_s1 + $0x20] sm:$0x3f]  ;;  %v52_v26 = vld [vmem:[%s4564_s1 + $0x30] sm:$0x3f] }
   0x5   :  { %v4162_v16 = vsub.s32 %v169_v12, %v171_v9  ;;  %v55_v29 = vld [vmem:[%s4564_s1 + $0x48] sm:$0x3f]  ;;  %v217_v32 = vcombine.high %v25_v22, %v25_v22  ;;  %v57_v33 = vld [vmem:[%s4564_s1 + $0x58] sm:$0x3f]  ;;  %v26_v34 = vld [vmem:[%s4563_s0 + $0x20] sm:$0xff] }
   0x6   :  { %v54_v35 = vld [vmem:[%s4564_s1 + $0x40] sm:$0x3f]  ;;  %v56_v36 = vld [vmem:[%s4564_s1 + $0x50] sm:$0x3f]  ;;  %v59_v39 = vld [vmem:[%s4564_s1 + $0x68] sm:$0x3f]  ;;  %v234_v42 = vcombine.high %v26_v34, %v26_v34 }
   0x7   :  { %v173_v18 = vrot.slane %v22_v5, %v4162_v16  ;;  %v180_v19 = vrot.slane %v166_v13, %v4162_v16  ;;  %v190_v20 = vrot.slane %v23_v6, %v4162_v16  ;;  %v197_v21 = vrot.slane %v183_v14, %v4162_v16  ;;  %v61_v43 = vld [vmem:[%s4564_s1 + $0x78] sm:$0x3f]  ;;  %v27_v44 = vld [vmem:[%s4563_s0 + $0x28] sm:$0xff]  ;;  %v58_v45 = vld [vmem:[%s4564_s1 + $0x60] sm:$0x3f] }
   0x8   :  { %v207_v28 = vrot.slane %v24_v15, %v4162_v16  ;;  %v214_v31 = vrot.slane %v200_v17, %v4162_v16  ;;  %v224_v38 = vrot.slane %v25_v22, %v4162_v16  ;;  %v231_v41 = vrot.slane %v217_v32, %v4162_v16  ;;  %v60_v46 = vld [vmem:[%s4564_s1 + $0x70] sm:$0x3f]  ;;  %v63_v49 = vld [vmem:[%s4564_s1 + $0x88] sm:$0x3f]  ;;  %v65_v53 = vld [vmem:[%s4564_s1 + $0x98] sm:$0x3f] }
   0x9   :  { %v181_v23 = vcombine.high %v173_v18, %v173_v18  ;;  %v182_v24 = vcombine.high %v180_v19, %v180_v19  ;;  %v198_v27 = vcombine.high %v190_v20, %v190_v20  ;;  %v199_v30 = vcombine.high %v197_v21, %v197_v21  ;;  %v28_v54 = vld [vmem:[%s4563_s0 + $0x30] sm:$0xff]  ;;  %v62_v55 = vld [vmem:[%s4564_s1 + $0x80] sm:$0x3f]  ;;  %v67_v59 = vld [vmem:[%s4564_s1 + $0xa8] sm:$0x3f] }
   0xa   :  { %v215_v37 = vcombine.high %v207_v28, %v207_v28  ;;  %v216_v40 = vcombine.high %v214_v31, %v214_v31  ;;  %v232_v47 = vcombine.high %v224_v38, %v224_v38  ;;  %v241_v48 = vrot.slane %v26_v34, %v4162_v16  ;;  %v64_v56 = vld [vmem:[%s4564_s1 + $0x90] sm:$0x3f]  ;;  %v69_v63 = vld [vmem:[%s4564_s1 + $0xb8] sm:$0x3f]  ;;  %v66_v1 = vld [vmem:[%s4564_s1 + $0xa0] sm:$0x3f] }
   0xb   :  { %734 = vmatprep.mubr.f32.mxu0 %v181_v23  ;;  %804 = vmatprep.mubr.f32.mxu1 %v182_v24  ;;  %v233_v50 = vcombine.high %v231_v41, %v231_v41  ;;  %v248_v51 = vrot.slane %v234_v42, %v4162_v16  ;;  %v251_v52 = vcombine.high %v27_v44, %v27_v44  ;;  %v29_v0 = vld [vmem:[%s4563_s0 + $0x38] sm:$0xff]  ;;  %v68_v2 = vld [vmem:[%s4564_s1 + $0xb0] sm:$0x3f]  ;;  %v71_v5 = vld [vmem:[%s4564_s1 + $0xc8] sm:$0x3f] }
   0xc   :  { %735 = vmatmul.mubr.f32.vlgmr.msra.gmra.mrb[0].mxu0 %v173_v18  ;;  %805 = vmatmul.mubr.f32.vlgmr.msra.gmra.mrb[0].mxu1 %v180_v19  ;;  %v249_v57 = vcombine.high %v241_v48, %v241_v48  ;;  %v258_v58 = vrot.slane %v27_v44, %v4162_v16  ;;  %v268_v62 = vcombine.high %v28_v54, %v28_v54  ;;  %v73_v9 = vld [vmem:[%s4564_s1 + $0xd8] sm:$0x3f]  ;;  %v30_v10 = vld [vmem:[%s4563_s0 + $0x40] sm:$0xff]  ;;  %v72_v12 = vld [vmem:[%s4564_s1 + $0xd0] sm:$0x3f] }
   0xd   :  { %811 = vmatpush1.xpose.msra.mxu0 %v50_v25  ;;  %881 = vmatpush1.xpose.msra.mxu1 %v52_v26  ;;  %v250_v60 = vcombine.high %v248_v51, %v248_v51  ;;  %v265_v61 = vrot.slane %v251_v52, %v4162_v16  ;;  %v275_v4 = vrot.slane %v28_v54, %v4162_v16  ;;  %v70_v11 = vld [vmem:[%s4564_s1 + $0xc0] sm:$0x3f]  ;;  %v75_v15 = vld [vmem:[%s4564_s1 + $0xe8] sm:$0x3f]  ;;  %v76_v23 = vld [vmem:[%s4564_s1 + $0xf0] sm:$0x3f] }
   0xe   :  { %874 = vmatprep.mubr.f32.mxu0 %v198_v27  ;;  %950 = vmatprep.subr.mxu0 %v55_v29  ;;  %v266_v3 = vcombine.high %v258_v58, %v258_v58  ;;  %v282_v7 = vrot.slane %v268_v62, %v4162_v16  ;;  %v285_v8 = vcombine.high %v29_v0, %v29_v0  ;;  %v74_v22 = vld [vmem:[%s4564_s1 + $0xe0] sm:$0x3f]  ;;  %v79_v26 = vld [vmem:[%s4564_s1 + $0x108] sm:$0x3f] }
   0xf   :  { %944 = vmatprep.mubr.f32.mxu1 %v199_v30  ;;  %1020 = vmatprep.subr.mxu1 %v57_v33  ;;  %v267_v6 = vcombine.high %v265_v61, %v265_v61  ;;  %v283_v13 = vcombine.high %v275_v4, %v275_v4  ;;  %v292_v14 = vrot.slane %v29_v0, %v4162_v16  ;;  %v81_v30 = vld [vmem:[%s4564_s1 + $0x118] sm:$0x3f]  ;;  %v78_v32 = vld [vmem:[%s4564_s1 + $0x100] sm:$0x3f]  ;;  %v80_v33 = vld [vmem:[%s4564_s1 + $0x110] sm:$0x3f] }
  0x10   :  { %875 = vmatmul.mubr.f32.vlgmr.msra.gmra.mrb[2].mxu0 %v190_v20  ;;  %945 = vmatmul.mubr.f32.vlgmr.msra.gmra.mrb[2].mxu1 %v197_v21  ;;  %v284_v17 = vcombine.high %v282_v7, %v282_v7  ;;  %v299_v18 = vrot.slane %v285_v8, %v4162_v16  ;;  %v302_v19 = vcombine.high %v30_v10, %v30_v10  ;;  %v77_v20 = vld [vmem:[%s4564_s1 + $0xf8] sm:$0x3f]  ;;  %v31_v21 = vld [vmem:[%s4563_s0 + $0x48] sm:$0xff] }
  0x11   :  { %951 = vmatpush1.xpose.msra.mxu0 %v54_v35  ;;  %1021 = vmatpush1.xpose.msra.mxu1 %v56_v36  ;;  %v300_v24 = vcombine.high %v292_v14, %v292_v14  ;;  %v309_v25 = vrot.slane %v30_v10, %v4162_v16  ;;  %v319_v29 = vcombine.high %v31_v21, %v31_v21  ;;  %v83_v36 = vld [vmem:[%s4564_s1 + $0x128] sm:$0x3f] }
  0x12   :  { %1014 = vmatprep.mubr.f32.mxu0 %v215_v37  ;;  %1090 = vmatprep.subr.mxu0 %v59_v39  ;;  %v301_v27 = vcombine.high %v299_v18, %v299_v18  ;;  %v326_v35 = vrot.slane %v31_v21, %v4162_v16 }
  0x13   :  { %1084 = vmatprep.mubr.f32.mxu1 %v216_v40  ;;  %1160 = vmatprep.subr.mxu1 %v61_v43  ;;  %v317_v34 = vcombine.high %v309_v25, %v309_v25 }
  0x14   :  { %1015 = vmatmul.mubr.f32.vlgmr.msra.gmra.mrb[4].mxu0 %v207_v28  ;;  %1085 = vmatmul.mubr.f32.vlgmr.msra.gmra.mrb[4].mxu1 %v214_v31  ;;  %v316_v28 = vrot.slane %v302_v19, %v4162_v16  ;;  %v32_v31 = vld [vmem:[%s4563_s0 + $0x50] sm:$0xff] }
  0x15   :  { %1091 = vmatpush1.xpose.msra.mxu0 %v58_v45  ;;  %1161 = vmatpush1.xpose.msra.mxu1 %v60_v46  ;;  %v336_v39 = vcombine.high %v32_v31, %v32_v31 }
  0x16   :  { %1154 = vmatprep.mubr.f32.mxu0 %v232_v47  ;;  %1230 = vmatprep.subr.mxu0 %v63_v49  ;;  %v318_v37 = vcombine.high %v316_v28, %v316_v28 }
  0x17   :  { %1224 = vmatprep.mubr.f32.mxu1 %v233_v50  ;;  %1300 = vmatprep.subr.mxu1 %v65_v53 }
  0x18   :  { %1155 = vmatmul.mubr.f32.vlgmr.msra.gmra.mrb[6].mxu0 %v224_v38  ;;  %1225 = vmatmul.mubr.f32.vlgmr.msra.gmra.mrb[6].mxu1 %v231_v41  ;;  %v333_v38 = vrot.slane %v319_v29, %v4162_v16 }
  0x19   :  { %1231 = vmatpush1.xpose.msra.mxu0 %v62_v55  ;;  %1301 = vmatpush1.xpose.msra.mxu1 %v64_v56 }
  0x1a   :  { %1294 = vmatprep.mubr.f32.mxu0 %v249_v57  ;;  %1370 = vmatprep.subr.mxu0 %v67_v59 }
  0x1b   :  { %1364 = vmatprep.mubr.f32.mxu1 %v250_v60  ;;  %1440 = vmatprep.subr.mxu1 %v69_v63 }
  0x1c   :  { %1295 = vmatmul.mubr.f32.vlgmr.msra.gmra.mrb[8].mxu0 %v241_v48  ;;  %1365 = vmatmul.mubr.f32.vlgmr.msra.gmra.mrb[8].mxu1 %v248_v51 }
  0x1d   :  { %1371 = vmatpush1.xpose.msra.mxu0 %v66_v1  ;;  %1441 = vmatpush1.xpose.msra.mxu1 %v68_v2 }
  0x1e   :  { %1434 = vmatprep.mubr.f32.mxu0 %v266_v3  ;;  %1510 = vmatprep.subr.mxu0 %v71_v5 }
  0x1f   :  { %1504 = vmatprep.mubr.f32.mxu1 %v267_v6  ;;  %1580 = vmatprep.subr.mxu1 %v73_v9 }
  0x20   :  { %1435 = vmatmul.mubr.f32.vlgmr.msra.gmra.mrb[10].mxu0 %v258_v58  ;;  %1505 = vmatmul.mubr.f32.vlgmr.msra.gmra.mrb[10].mxu1 %v265_v61 }
  0x21   :  { %1511 = vmatpush1.xpose.msra.mxu0 %v70_v11  ;;  %1581 = vmatpush1.xpose.msra.mxu1 %v72_v12 }
  0x22   :  { %1574 = vmatprep.mubr.f32.mxu0 %v283_v13  ;;  %1650 = vmatprep.subr.mxu0 %v75_v15 }
  0x23   :  { %1644 = vmatprep.mubr.f32.mxu1 %v284_v17  ;;  %1720 = vmatprep.subr.mxu1 %v77_v20 }
  0x24   :  { %1575 = vmatmul.mubr.f32.vlgmr.msra.gmra.mrb[12].mxu0 %v275_v4  ;;  %1645 = vmatmul.mubr.f32.vlgmr.msra.gmra.mrb[12].mxu1 %v282_v7 }
  0x25   :  { %1651 = vmatpush1.xpose.msra.mxu0 %v74_v22  ;;  %1721 = vmatpush1.xpose.msra.mxu1 %v76_v23 }
  0x26   :  { %1714 = vmatprep.mubr.f32.mxu0 %v300_v24  ;;  %1790 = vmatprep.subr.mxu0 %v79_v26 }
  0x27   :  { %1784 = vmatprep.mubr.f32.mxu1 %v301_v27  ;;  %1860 = vmatprep.subr.mxu1 %v81_v30 }
  0x28   :  { %8 = vsyncpa [#allocation4], 0  ;;  %1715 = vmatmul.mubr.f32.vlgmr.msra.gmra.mrb[14].mxu0 %v292_v14  ;;  %1785 = vmatmul.mubr.f32.vlgmr.msra.gmra.mrb[14].mxu1 %v299_v18  ;;  %v85_v40 = vld [vmem:[%s4564_s1 + $0x138] sm:$0x3f]  ;;  %v82_v42 = vld [vmem:[%s4564_s1 + $0x120] sm:$0x3f]  ;;  %v334_v44 = vcombine.high %v326_v35, %v326_v35  ;;  %v343_v45 = vrot.slane %v32_v31, %v4162_v16  ;;  %v335_v47 = vcombine.high %v333_v38, %v333_v38 }
  0x29   :  { %v33_v41 = vld [vmem:[%s4563_s0 + $0x58] sm:$0xff]  ;;  %1791 = vmatpush1.xpose.msra.mxu0 %v78_v32  ;;  %1861 = vmatpush1.xpose.msra.mxu1 %v80_v33  ;;  %v84_v43 = vld [vmem:[%s4564_s1 + $0x130] sm:$0x3f]  ;;  %v87_v46 = vld [vmem:[%s4564_s1 + $0x148] sm:$0x3f]  ;;  %v350_v48 = vrot.slane %v336_v39, %v4162_v16  ;;  %vm19_vm0 = vcmask 41984  }
  0x2a   :  { %1854 = vmatprep.mubr.f32.mxu0 %v317_v34  ;;  %1930 = vmatprep.subr.mxu0 %v83_v36  ;;  %v353_v49 = vcombine.high %v33_v41, %v33_v41  ;;  %v89_v50 = vld [vmem:[%s4564_s1 + $0x158] sm:$0x3f]  ;;  %v34_v51 = vld [vmem:[%s4563_s0 + $0x60] sm:$0xff]  ;;  %v88_v53 = vld [vmem:[%s4564_s1 + $0x150] sm:$0x3f]  ;;  %v351_v54 = vcombine.high %v343_v45, %v343_v45  ;;  %v360_v55 = vrot.slane %v33_v41, %v4162_v16  ;;  %s4114_s9 = smov [#allocation3]  }
  0x2b   :  { %1924 = vmatprep.mubr.f32.mxu1 %v318_v37  ;;  %2000 = vmatprep.subr.mxu1 %v85_v40  ;;  %v86_v52 = vld [vmem:[%s4564_s1 + $0x140] sm:$0x3f]  ;;  %v91_v56 = vld [vmem:[%s4564_s1 + $0x168] sm:$0x3f]  ;;  %v352_v57 = vcombine.high %v350_v48, %v350_v48  ;;  %v370_v59 = vcombine.high %v34_v51, %v34_v51  ;;  %v93_v60 = vld [vmem:[%s4564_s1 + $0x178] sm:$0x3f]  ;;  %v377_v1 = vrot.slane %v34_v51, %v4162_v16 }
  0x2c   :  { %1855 = vmatmul.mubr.f32.vlgmr.msra.gmra.mrb[16].mxu0 %v309_v25  ;;  %1925 = vmatmul.mubr.f32.vlgmr.msra.gmra.mrb[16].mxu1 %v316_v28  ;;  %v367_v58 = vrot.slane %v353_v49, %v4162_v16  ;;  %v35_v61 = vld [vmem:[%s4563_s0 + $0x68] sm:$0xff]  ;;  %v90_v62 = vld [vmem:[%s4564_s1 + $0x160] sm:$0x3f]  ;;  %v92_v63 = vld [vmem:[%s4564_s1 + $0x170] sm:$0x3f]  ;;  %v368_v0 = vcombine.high %v360_v55, %v360_v55  ;;  %s4052_s10 = sshll.u32 %s4114_s9, 4  ;;  %s4053_s10 = int_to_ptr.vmem [resolvable:$true] %s4052_s10 }
  0x2d   :  { %1931 = vmatpush1.xpose.msra.mxu0 %v82_v42  ;;  %2001 = vmatpush1.xpose.msra.mxu1 %v84_v43  ;;  %v95_v2 = vld [vmem:[%s4564_s1 + $0x188] sm:$0x3f]  ;;  %v384_v4 = vrot.slane %v370_v59, %v4162_v16  ;;  %v387_v5 = vcombine.high %v35_v61, %v35_v61  ;;  %v97_v6 = vld [vmem:[%s4564_s1 + $0x198] sm:$0x3f]  ;;  %v36_v7 = vld [vmem:[%s4563_s0 + $0x70] sm:$0xff]  ;;  %v385_v10 = vcombine.high %v377_v1, %v377_v1  ;;  %s4088_s11 = scalar_lea.vmem %s4053_s10, 32  ;;  %p4093_p1 = scmp.lt.s32.totalorder %s4053_s10, %s4053_s10 }
  0x2e   :  { %1994 = vmatprep.mubr.f32.mxu0 %v334_v44  ;;  %2070 = vmatprep.subr.mxu0 %v87_v46  ;;  %v369_v3 = vcombine.high %v367_v58, %v367_v58  ;;  %v94_v8 = vld [vmem:[%s4564_s1 + $0x180] sm:$0x3f]  ;;  %v96_v9 = vld [vmem:[%s4564_s1 + $0x190] sm:$0x3f]  ;;  %v394_v11 = vrot.slane %v35_v61, %v4162_v16  ;;  %v99_v12 = vld [vmem:[%s4564_s1 + $0x1a8] sm:$0x3f]  ;;  %v404_v15 = vcombine.high %v36_v7, %v36_v7  ;;  %p4089_p0 = scmp.ne.s32.totalorder %s4053_s10, %s4088_s11  ;;  %p4094_p2 = scmp.lt.s32.totalorder %s4088_s11, %s4088_s11 }
  0x2f   :  { %2064 = vmatprep.mubr.f32.mxu1 %v335_v47  ;;  %2140 = vmatprep.subr.mxu1 %v89_v50  ;;  %v386_v13 = vcombine.high %v384_v4, %v384_v4  ;;  %v401_v14 = vrot.slane %v387_v5, %v4162_v16  ;;  %v101_v17 = vld [vmem:[%s4564_s1 + $0x1b8] sm:$0x3f]  ;;  %v98_v19 = vld [vmem:[%s4564_s1 + $0x1a0] sm:$0x3f]  ;;  %v100_v20 = vld [vmem:[%s4564_s1 + $0x1b0] sm:$0x3f]  ;;  %v411_v22 = vrot.slane %v36_v7, %v4162_v16 }
  0x30   :  { %1995 = vmatmul.mubr.f32.vlgmr.msra.gmra.mrb[18].mxu0 %v326_v35  ;;  %2065 = vmatmul.mubr.f32.vlgmr.msra.gmra.mrb[18].mxu1 %v333_v38  ;;  %v37_v18 = vld [vmem:[%s4563_s0 + $0x78] sm:$0xff]  ;;  %v402_v21 = vcombine.high %v394_v11, %v394_v11  ;;  %v103_v23 = vld [vmem:[%s4564_s1 + $0x1c8] sm:$0x3f]  ;;  %v418_v25 = vrot.slane %v404_v15, %v4162_v16  ;;  %v38_v28 = vld [vmem:[%s4563_s0 + $0x80] sm:$0xff]  ;;  %p4095_p3 = por %p4094_p2, %p4093_p1 }
  0x31   :  { %2071 = vmatpush1.xpose.msra.mxu0 %v86_v52  ;;  %2141 = vmatpush1.xpose.msra.mxu1 %v88_v53  ;;  %v403_v24 = vcombine.high %v401_v14, %v401_v14  ;;  %v421_v26 = vcombine.high %v37_v18, %v37_v18  ;;  %v105_v27 = vld [vmem:[%s4564_s1 + $0x1d8] sm:$0x3f]  ;;  %v102_v29 = vld [vmem:[%s4564_s1 + $0x1c0] sm:$0x3f]  ;;  %v104_v30 = vld [vmem:[%s4564_s1 + $0x1d0] sm:$0x3f]  ;;  %v419_v31 = vcombine.high %v411_v22, %v411_v22 }
  0x32   :  { %2134 = vmatprep.mubr.f32.mxu0 %v351_v54  ;;  %2210 = vmatprep.subr.mxu0 %v91_v56  ;;  %v428_v32 = vrot.slane %v37_v18, %v4162_v16  ;;  %v107_v33 = vld [vmem:[%s4564_s1 + $0x1e8] sm:$0x3f]  ;;  %v420_v34 = vcombine.high %v418_v25, %v418_v25  ;;  %v438_v36 = vcombine.high %v38_v28, %v38_v28  ;;  %v109_v37 = vld [vmem:[%s4564_s1 + $0x1f8] sm:$0x3f]  ;;  %v106_v39 = vld [vmem:[%s4564_s1 + $0x1e0] sm:$0x3f]  ;;  %p4096_p4 = pnand %p4095_p3, %p4089_p0 }
  0x33   :  { %2204 = vmatprep.mubr.f32.mxu1 %v352_v57  ;;  %2280 = vmatprep.subr.mxu1 %v93_v60  ;;  %v435_v35 = vrot.slane %v421_v26, %v4162_v16  ;;  %v39_v38 = vld [vmem:[%s4563_s0 + $0x88] sm:$0xff]  ;;  %v108_v40 = vld [vmem:[%s4564_s1 + $0x1f0] sm:$0x3f]  ;;  %v445_v42 = vrot.slane %v38_v28, %v4162_v16  ;;  %v113_v47 = vld [vmem:[%s4564_s1 + $0x218] sm:$0x3f] }
  0x34   :  { %2135 = vmatmul.mubr.f32.vlgmr.msra.gmra.mrb[20].mxu0 %v343_v45  ;;  %2205 = vmatmul.mubr.f32.vlgmr.msra.gmra.mrb[20].mxu1 %v350_v48  ;;  %v436_v41 = vcombine.high %v428_v32, %v428_v32  ;;  %v111_v43 = vld [vmem:[%s4564_s1 + $0x208] sm:$0x3f]  ;;  %v452_v45 = vrot.slane %v438_v36, %v4162_v16  ;;  %v455_v46 = vcombine.high %v39_v38, %v39_v38  ;;  %v40_v48 = vld [vmem:[%s4563_s0 + $0x90] sm:$0xff]  ;;  %v110_v49 = vld [vmem:[%s4564_s1 + $0x200] sm:$0x3f] }
  0x35   :  { %2211 = vmatpush1.xpose.msra.mxu0 %v90_v62  ;;  %2281 = vmatpush1.xpose.msra.mxu1 %v92_v63  ;;  %v437_v44 = vcombine.high %v435_v35, %v435_v35  ;;  %v112_v50 = vld [vmem:[%s4564_s1 + $0x210] sm:$0x3f]  ;;  %v453_v51 = vcombine.high %v445_v42, %v445_v42  ;;  %v462_v52 = vrot.slane %v39_v38, %v4162_v16  ;;  %v115_v53 = vld [vmem:[%s4564_s1 + $0x228] sm:$0x3f]  ;;  %v117_v57 = vld [vmem:[%s4564_s1 + $0x238] sm:$0x3f] }
  0x36   :  { %2274 = vmatprep.mubr.f32.mxu0 %v368_v0  ;;  %2350 = vmatprep.subr.mxu0 %v95_v2  ;;  %v454_v54 = vcombine.high %v452_v45, %v452_v45  ;;  %v472_v56 = vcombine.high %v40_v48, %v40_v48  ;;  %v114_v59 = vld [vmem:[%s4564_s1 + $0x220] sm:$0x3f]  ;;  %v116_v60 = vld [vmem:[%s4564_s1 + $0x230] sm:$0x3f]  ;;  %v479_v62 = vrot.slane %v40_v48, %v4162_v16  ;;  %v119_v63 = vld [vmem:[%s4564_s1 + $0x248] sm:$0x3f] }
  0x37   :  { %2344 = vmatprep.mubr.f32.mxu1 %v369_v3  ;;  %2420 = vmatprep.subr.mxu1 %v97_v6  ;;  %v470_v61 = vcombine.high %v462_v52, %v462_v52  ;;  %v121_v3 = vld [vmem:[%s4564_s1 + $0x258] sm:$0x3f]  ;;  %v118_v5 = vld [vmem:[%s4564_s1 + $0x240] sm:$0x3f]  ;;  %v120_v6 = vld [vmem:[%s4564_s1 + $0x250] sm:$0x3f] }
  0x38   :  { %2275 = vmatmul.mubr.f32.vlgmr.msra.gmra.mrb[22].mxu0 %v360_v55  ;;  %2345 = vmatmul.mubr.f32.vlgmr.msra.gmra.mrb[22].mxu1 %v367_v58  ;;  %v469_v55 = vrot.slane %v455_v46, %v4162_v16  ;;  %v41_v58 = vld [vmem:[%s4563_s0 + $0x98] sm:$0xff]  ;;  %v487_v7 = vcombine.high %v479_v62, %v479_v62  ;;  %v122_v15 = vld [vmem:[%s4564_s1 + $0x260] sm:$0x3f]  ;;  %v136_v46 = vld [vmem:[%s4564_s1 + $0x2d0] sm:$0x3f] }
  0x39   :  { %2351 = vmatpush1.xpose.msra.mxu0 %v94_v8  ;;  %2421 = vmatpush1.xpose.msra.mxu1 %v96_v9  ;;  %v489_v2 = vcombine.high %v41_v58, %v41_v58  ;;  %v496_v8 = vrot.slane %v41_v58, %v4162_v16  ;;  %v123_v9 = vld [vmem:[%s4564_s1 + $0x268] sm:$0x3f]  ;;  %v126_v26 = vld [vmem:[%s4564_s1 + $0x280] sm:$0x3f] }
  0x3a   :  { %2414 = vmatprep.mubr.f32.mxu0 %v385_v10  ;;  %2490 = vmatprep.subr.mxu0 %v99_v12  ;;  %v471_v0 = vcombine.high %v469_v55, %v469_v55  ;;  %v130_v36 = vld [vmem:[%s4564_s1 + $0x2a0] sm:$0x3f] }
  0x3b   :  { %2484 = vmatprep.mubr.f32.mxu1 %v386_v13  ;;  %2560 = vmatprep.subr.mxu1 %v101_v17  ;;  %v125_v13 = vld [vmem:[%s4564_s1 + $0x278] sm:$0x3f]  ;;  %v124_v17 = vld [vmem:[%s4564_s1 + $0x270] sm:$0x3f]  ;;  %v504_v18 = vcombine.high %v496_v8, %v496_v8 }
  0x3c   :  { %2415 = vmatmul.mubr.f32.vlgmr.msra.gmra.mrb[24].mxu0 %v377_v1  ;;  %2485 = vmatmul.mubr.f32.vlgmr.msra.gmra.mrb[24].mxu1 %v384_v4  ;;  %v486_v1 = vrot.slane %v472_v56, %v4162_v16  ;;  %v42_v4 = vld [vmem:[%s4563_s0 + $0xa0] sm:$0xff]  ;;  %v4113_v56 = vmov 0.0  }
  0x3d   :  { %2491 = vmatpush1.xpose.msra.mxu0 %v98_v19  ;;  %2561 = vmatpush1.xpose.msra.mxu1 %v100_v20  ;;  %v506_v12 = vcombine.high %v42_v4, %v42_v4  ;;  %v513_v19 = vrot.slane %v42_v4, %v4162_v16  ;;  %v127_v20 = vld [vmem:[%s4564_s1 + $0x288] sm:$0x3f]  ;;  %20 = vst.msk [vmem:[#allocation2] sm:$0x3] %vm19_vm0, %v4113_v56 }
  0x3e   :  { %2554 = vmatprep.mubr.f32.mxu0 %v402_v21  ;;  %2630 = vmatprep.subr.mxu0 %v103_v23  ;;  %v488_v10 = vcombine.high %v486_v1, %v486_v1 }
  0x3f   :  { %2624 = vmatprep.mubr.f32.mxu1 %v403_v24  ;;  %2700 = vmatprep.subr.mxu1 %v105_v27  ;;  %v129_v24 = vld [vmem:[%s4564_s1 + $0x298] sm:$0x3f]  ;;  %v128_v27 = vld [vmem:[%s4564_s1 + $0x290] sm:$0x3f]  ;;  %v521_v28 = vcombine.high %v513_v19, %v513_v19 }
  0x40   :  { %2555 = vmatmul.mubr.f32.vlgmr.msra.gmra.mrb[26].mxu0 %v394_v11  ;;  %2625 = vmatmul.mubr.f32.vlgmr.msra.gmra.mrb[26].mxu1 %v401_v14  ;;  %v503_v11 = vrot.slane %v489_v2, %v4162_v16  ;;  %v43_v14 = vld [vmem:[%s4563_s0 + $0xa8] sm:$0xff] }
  0x41   :  { %2631 = vmatpush1.xpose.msra.mxu0 %v102_v29  ;;  %2701 = vmatpush1.xpose.msra.mxu1 %v104_v30  ;;  %v523_v23 = vcombine.high %v43_v14, %v43_v14  ;;  %v530_v29 = vrot.slane %v43_v14, %v4162_v16  ;;  %v131_v30 = vld [vmem:[%s4564_s1 + $0x2a8] sm:$0x3f] }
  0x42   :  { %2694 = vmatprep.mubr.f32.mxu0 %v419_v31  ;;  %2770 = vmatprep.subr.mxu0 %v107_v33  ;;  %v505_v21 = vcombine.high %v503_v11, %v503_v11 }
  0x43   :  { %2764 = vmatprep.mubr.f32.mxu1 %v420_v34  ;;  %2840 = vmatprep.subr.mxu1 %v109_v37  ;;  %v45_v34 = vld [vmem:[%s4563_s0 + $0xb8] sm:$0xff]  ;;  %v132_v37 = vld [vmem:[%s4564_s1 + $0x2b0] sm:$0x3f]  ;;  %v538_v38 = vcombine.high %v530_v29, %v530_v29 }
  0x44   :  { %2695 = vmatmul.mubr.f32.vlgmr.msra.gmra.mrb[28].mxu0 %v411_v22  ;;  %2765 = vmatmul.mubr.f32.vlgmr.msra.gmra.mrb[28].mxu1 %v418_v25  ;;  %v520_v22 = vrot.slane %v506_v12, %v4162_v16  ;;  %v44_v25 = vld [vmem:[%s4563_s0 + $0xb0] sm:$0xff]  ;;  %v564_v48 = vrot.slane %v45_v34, %v4162_v16 }
  0x45   :  { %2771 = vmatpush1.xpose.msra.mxu0 %v106_v39  ;;  %2841 = vmatpush1.xpose.msra.mxu1 %v108_v40  ;;  %v540_v33 = vcombine.high %v44_v25, %v44_v25  ;;  %v547_v39 = vrot.slane %v44_v25, %v4162_v16  ;;  %v557_v40 = vcombine.high %v45_v34, %v45_v34 }
  0x46   :  { %2834 = vmatprep.mubr.f32.mxu0 %v436_v41  ;;  %2910 = vmatprep.subr.mxu0 %v111_v43  ;;  %v522_v31 = vcombine.high %v520_v22, %v520_v22  ;;  %v135_v41 = vld [vmem:[%s4564_s1 + $0x2c8] sm:$0x3f] }
  0x47   :  { %2904 = vmatprep.mubr.f32.mxu1 %v437_v44  ;;  %2980 = vmatprep.subr.mxu1 %v113_v47  ;;  %v554_v43 = vrot.slane %v540_v33, %v4162_v16  ;;  %v137_v44 = vld [vmem:[%s4564_s1 + $0x2d8] sm:$0x3f]  ;;  %v555_v47 = vcombine.high %v547_v39, %v547_v39 }
  0x48   :  { %2835 = vmatmul.mubr.f32.vlgmr.msra.gmra.mrb[30].mxu0 %v428_v32  ;;  %2905 = vmatmul.mubr.f32.vlgmr.msra.gmra.mrb[30].mxu1 %v435_v35  ;;  %v537_v32 = vrot.slane %v523_v23, %v4162_v16  ;;  %v133_v35 = vld [vmem:[%s4564_s1 + $0x2b8] sm:$0x3f] }
  0x49   :  { %2911 = vmatpush1.xpose.msra.mxu0 %v110_v49  ;;  %2981 = vmatpush1.xpose.msra.mxu1 %v112_v50  ;;  %v571_v49 = vrot.slane %v557_v40, %v4162_v16  ;;  %v139_v50 = vld [vmem:[%s4564_s1 + $0x2e8] sm:$0x3f]  ;;  %v138_v16 = vld [vmem:[%s4564_s1 + $0x2e0] sm:$0x3f] }
  0x4a   :  { %2974 = vmatprep.mubr.f32.mxu0 %v453_v51  ;;  %3050 = vmatprep.subr.mxu0 %v115_v53  ;;  %v556_v51 = vcombine.high %v554_v43, %v554_v43  ;;  %v140_v53 = vld [vmem:[%s4564_s1 + $0x2f0] sm:$0x3f] }
  0x4b   :  { %3044 = vmatprep.mubr.f32.mxu1 %v454_v54  ;;  %3120 = vmatprep.subr.mxu1 %v117_v57  ;;  %v572_v54 = vcombine.high %v564_v48, %v564_v48 }
  0x4c   :  { %2975 = vmatmul.mubr.f32.vlgmr.msra.gmra.mrb[32].mxu0 %v445_v42  ;;  %3045 = vmatmul.mubr.f32.vlgmr.msra.gmra.mrb[32].mxu1 %v452_v45  ;;  %v539_v42 = vcombine.high %v537_v32, %v537_v32  ;;  %v134_v45 = vld [vmem:[%s4564_s1 + $0x2c0] sm:$0x3f] }
  0x4d   :  { %3051 = vmatpush1.xpose.msra.mxu0 %v114_v59  ;;  %3121 = vmatpush1.xpose.msra.mxu1 %v116_v60 }
  0x4e   :  { %3114 = vmatprep.mubr.f32.mxu0 %v470_v61  ;;  %3190 = vmatprep.subr.mxu0 %v119_v63 }
  0x4f   :  { %3184 = vmatprep.mubr.f32.mxu1 %v471_v0  ;;  %3260 = vmatprep.subr.mxu1 %v121_v3 }
  0x50   :  { %3115 = vmatmul.mubr.f32.vlgmr.msra.gmra.mrb[34].mxu0 %v462_v52  ;;  %3185 = vmatmul.mubr.f32.vlgmr.msra.gmra.mrb[34].mxu1 %v469_v55  ;;  %v141_v52 = vld [vmem:[%s4564_s1 + $0x2f8] sm:$0x3f]  ;;  %v573_v55 = vcombine.high %v571_v49, %v571_v49 }
  0x51   :  { %3191 = vmatpush1.xpose.msra.mxu0 %v118_v5  ;;  %3261 = vmatpush1.xpose.msra.mxu1 %v120_v6 }
  0x52   :  { %3254 = vmatprep.mubr.f32.mxu0 %v487_v7  ;;  %3330 = vmatprep.subr.mxu0 %v123_v9 }
  0x53   :  { %3324 = vmatprep.mubr.f32.mxu1 %v488_v10  ;;  %3400 = vmatprep.subr.mxu1 %v125_v13 }
  0x54   :  { %3255 = vmatmul.mubr.f32.vlgmr.msra.gmra.mrb[36].mxu0 %v479_v62  ;;  %3325 = vmatmul.mubr.f32.vlgmr.msra.gmra.mrb[36].mxu1 %v486_v1 }
  0x55   :  { %3331 = vmatpush1.xpose.msra.mxu0 %v122_v15  ;;  %3401 = vmatpush1.xpose.msra.mxu1 %v124_v17 }
  0x56   :  { %3394 = vmatprep.mubr.f32.mxu0 %v504_v18  ;;  %3470 = vmatprep.subr.mxu0 %v127_v20 }
  0x57   :  { %3464 = vmatprep.mubr.f32.mxu1 %v505_v21  ;;  %3540 = vmatprep.subr.mxu1 %v129_v24 }
  0x58   :  { %3395 = vmatmul.mubr.f32.vlgmr.msra.gmra.mrb[38].mxu0 %v496_v8  ;;  %3465 = vmatmul.mubr.f32.vlgmr.msra.gmra.mrb[38].mxu1 %v503_v11 }
  0x59   :  { %3471 = vmatpush1.xpose.msra.mxu0 %v126_v26  ;;  %3541 = vmatpush1.xpose.msra.mxu1 %v128_v27 }
  0x5a   :  { %3534 = vmatprep.mubr.f32.mxu0 %v521_v28  ;;  %3610 = vmatprep.subr.mxu0 %v131_v30 }
  0x5b   :  { %3604 = vmatprep.mubr.f32.mxu1 %v522_v31  ;;  %3680 = vmatprep.subr.mxu1 %v133_v35 }
  0x5c   :  { %3535 = vmatmul.mubr.f32.vlgmr.msra.gmra.mrb[40].mxu0 %v513_v19  ;;  %3605 = vmatmul.mubr.f32.vlgmr.msra.gmra.mrb[40].mxu1 %v520_v22 }
  0x5d   :  { %3611 = vmatpush1.xpose.msra.mxu0 %v130_v36  ;;  %3681 = vmatpush1.xpose.msra.mxu1 %v132_v37 }
  0x5e   :  { %3674 = vmatprep.mubr.f32.mxu0 %v538_v38  ;;  %3750 = vmatprep.subr.mxu0 %v135_v41 }
  0x5f   :  { %3744 = vmatprep.mubr.f32.mxu1 %v539_v42  ;;  %3820 = vmatprep.subr.mxu1 %v137_v44 }
  0x60   :  { %3675 = vmatmul.mubr.f32.vlgmr.msra.gmra.mrb[42].mxu0 %v530_v29  ;;  %3745 = vmatmul.mubr.f32.vlgmr.msra.gmra.mrb[42].mxu1 %v537_v32 }
  0x61   :  { %3751 = vmatpush1.xpose.msra.mxu0 %v134_v45  ;;  %3821 = vmatpush1.xpose.msra.mxu1 %v136_v46 }
  0x62   :  { %3814 = vmatprep.mubr.f32.mxu0 %v555_v47  ;;  %3890 = vmatprep.subr.mxu0 %v139_v50 }
  0x63   :  { %3884 = vmatprep.mubr.f32.mxu1 %v556_v51  ;;  %3960 = vmatprep.subr.mxu1 %v141_v52 }
  0x64   :  { %3815 = vmatmul.mubr.f32.vlgmr.msra.gmra.mrb[44].mxu0 %v547_v39  ;;  %3885 = vmatmul.mubr.f32.vlgmr.msra.gmra.mrb[44].mxu1 %v554_v43 }
  0x65   :  { %3891 = vmatpush1.xpose.msra.mxu0 %v138_v16  ;;  %3961 = vmatpush1.xpose.msra.mxu1 %v140_v53 }
  0x66   :  { %3954 = vmatprep.mubr.f32.mxu0 %v572_v54  ;;  %4024 = vmatprep.mubr.f32.mxu1 %v573_v55 }
  0x68   :  { %3955 = vmatmul.mubr.f32.vlgmr.msra.gmra.mrb[46].mxu0 %v564_v48  ;;  %4025 = vmatmul.mubr.f32.vlgmr.msra.gmra.mrb[46].mxu1 %v571_v49 }
  0xdf   :  { %v736_v57 = vpop.f32.mrb[0].mxu0  ;;  %v806_v58 = vpop.f32.mrb[0].mxu1 }
  0xe0   :  { %v807_v59 = vadd.f32 %v806_v58, %v736_v57  ;;  %v738_v60 = vpop.f32.mrb[1].mxu0  ;;  %v808_v61 = vpop.f32.mrb[1].mxu1 }
  0xe3   :  { %v876_v62 = vpop.f32.mrb[2].mxu0  ;;  %v946_v63 = vpop.f32.mrb[2].mxu1 }
  0xe4   :  { %v877_v0 = vadd.f32 %v876_v62, %v807_v59  ;;  %v878_v1 = vpop.f32.mrb[3].mxu0  ;;  %v948_v2 = vpop.f32.mrb[3].mxu1 }
  0xe6   :  { %v947_v3 = vadd.f32 %v946_v63, %v877_v0 }
  0xe7   :  { %v1016_v4 = vpop.f32.mrb[4].mxu0  ;;  %v1086_v5 = vpop.f32.mrb[4].mxu1 }
  0xe8   :  { %v1017_v6 = vadd.f32 %v1016_v4, %v947_v3  ;;  %v1018_v7 = vpop.f32.mrb[5].mxu0  ;;  %v1088_v8 = vpop.f32.mrb[5].mxu1 }
  0xea   :  { %v1087_v9 = vadd.f32 %v1086_v5, %v1017_v6 }
  0xeb   :  { %v1156_v10 = vpop.f32.mrb[6].mxu0  ;;  %v1226_v11 = vpop.f32.mrb[6].mxu1 }
  0xec   :  { %v1157_v12 = vadd.f32 %v1156_v10, %v1087_v9  ;;  %v1158_v13 = vpop.f32.mrb[7].mxu0  ;;  %v1228_v14 = vpop.f32.mrb[7].mxu1 }
  0xee   :  { %v1227_v15 = vadd.f32 %v1226_v11, %v1157_v12 }
  0xef   :  { %v1296_v17 = vpop.f32.mrb[8].mxu0  ;;  %v1366_v18 = vpop.f32.mrb[8].mxu1 }
  0xf0   :  { %v1297_v19 = vadd.f32 %v1296_v17, %v1227_v15  ;;  %v1298_v20 = vpop.f32.mrb[9].mxu0  ;;  %v1368_v21 = vpop.f32.mrb[9].mxu1 }
  0xf2   :  { %v1367_v22 = vadd.f32 %v1366_v18, %v1297_v19 }
  0xf3   :  { %v1436_v23 = vpop.f32.mrb[10].mxu0  ;;  %v1506_v24 = vpop.f32.mrb[10].mxu1 }
  0xf4   :  { %v1437_v25 = vadd.f32 %v1436_v23, %v1367_v22  ;;  %v1438_v26 = vpop.f32.mrb[11].mxu0  ;;  %v1508_v27 = vpop.f32.mrb[11].mxu1 }
  0xf6   :  { %v1507_v28 = vadd.f32 %v1506_v24, %v1437_v25 }
  0xf7   :  { %v1576_v29 = vpop.f32.mrb[12].mxu0  ;;  %v1646_v30 = vpop.f32.mrb[12].mxu1 }
  0xf8   :  { %v1577_v31 = vadd.f32 %v1576_v29, %v1507_v28  ;;  %v1578_v32 = vpop.f32.mrb[13].mxu0  ;;  %v1648_v33 = vpop.f32.mrb[13].mxu1 }
  0xfa   :  { %v1647_v34 = vadd.f32 %v1646_v30, %v1577_v31 }
  0xfb   :  { %v1716_v35 = vpop.f32.mrb[14].mxu0  ;;  %v1786_v36 = vpop.f32.mrb[14].mxu1 }
  0xfc   :  { %v1717_v37 = vadd.f32 %v1716_v35, %v1647_v34  ;;  %v1718_v38 = vpop.f32.mrb[15].mxu0  ;;  %v1788_v39 = vpop.f32.mrb[15].mxu1 }
  0xfe   :  { %v1787_v40 = vadd.f32 %v1786_v36, %v1717_v37 }
  0xff   :  { %v1856_v41 = vpop.f32.mrb[16].mxu0  ;;  %v1926_v42 = vpop.f32.mrb[16].mxu1 }
 0x100   :  { %v1857_v43 = vadd.f32 %v1856_v41, %v1787_v40  ;;  %v1858_v44 = vpop.f32.mrb[17].mxu0  ;;  %v1928_v45 = vpop.f32.mrb[17].mxu1 }
 0x102   :  { %v1927_v46 = vadd.f32 %v1926_v42, %v1857_v43 }
 0x103   :  { %v1996_v47 = vpop.f32.mrb[18].mxu0  ;;  %v2066_v48 = vpop.f32.mrb[18].mxu1 }
 0x104   :  { %v1997_v49 = vadd.f32 %v1996_v47, %v1927_v46  ;;  %v1998_v50 = vpop.f32.mrb[19].mxu0  ;;  %v2068_v51 = vpop.f32.mrb[19].mxu1 }
 0x106   :  { %v2067_v52 = vadd.f32 %v2066_v48, %v1997_v49 }
 0x107   :  { %v2136_v16 = vpop.f32.mrb[20].mxu0  ;;  %v2206_v53 = vpop.f32.mrb[20].mxu1 }
 0x108   :  { %v2137_v54 = vadd.f32 %v2136_v16, %v2067_v52  ;;  %v2138_v55 = vpop.f32.mrb[21].mxu0  ;;  %v2208_v56 = vpop.f32.mrb[21].mxu1 }
 0x10a   :  { %v2207_v57 = vadd.f32 %v2206_v53, %v2137_v54 }
 0x10b   :  { %v2276_v58 = vpop.f32.mrb[22].mxu0  ;;  %v2346_v59 = vpop.f32.mrb[22].mxu1 }
 0x10c   :  { %v2277_v60 = vadd.f32 %v2276_v58, %v2207_v57  ;;  %v2278_v61 = vpop.f32.mrb[23].mxu0  ;;  %v2348_v62 = vpop.f32.mrb[23].mxu1 }
 0x10e   :  { %v2347_v63 = vadd.f32 %v2346_v59, %v2277_v60 }
 0x10f   :  { %v2416_v0 = vpop.f32.mrb[24].mxu0  ;;  %v2486_v1 = vpop.f32.mrb[24].mxu1 }
 0x110   :  { %v2417_v2 = vadd.f32 %v2416_v0, %v2347_v63  ;;  %v2418_v3 = vpop.f32.mrb[25].mxu0  ;;  %v2488_v4 = vpop.f32.mrb[25].mxu1 }
 0x112   :  { %v2487_v5 = vadd.f32 %v2486_v1, %v2417_v2 }
 0x113   :  { %v2556_v6 = vpop.f32.mrb[26].mxu0  ;;  %v2626_v7 = vpop.f32.mrb[26].mxu1 }
 0x114   :  { %v2557_v8 = vadd.f32 %v2556_v6, %v2487_v5  ;;  %v2558_v9 = vpop.f32.mrb[27].mxu0  ;;  %v2628_v10 = vpop.f32.mrb[27].mxu1 }
 0x115   :  { %v4060_v10 = vld [vmem:[%s4565_s2] ss:$0 sm:$0xff] }
 0x116   :  { %v2627_v11 = vadd.f32 %v2626_v7, %v2557_v8  ;;  %v21_v7 = vld [vmem:[#allocation2] sm:$0x3] }
 0x117   :  { %v2696_v12 = vpop.f32.mrb[28].mxu0  ;;  %v2766_v13 = vpop.f32.mrb[28].mxu1 }
 0x118   :  { %v2697_v14 = vadd.f32 %v2696_v12, %v2627_v11  ;;  %v2698_v15 = vpop.f32.mrb[29].mxu0  ;;  %v2768_v17 = vpop.f32.mrb[29].mxu1 }
 0x11a   :  { %v2767_v18 = vadd.f32 %v2766_v13, %v2697_v14 }
 0x11b   :  { %v2836_v19 = vpop.f32.mrb[30].mxu0  ;;  %v2906_v20 = vpop.f32.mrb[30].mxu1 }
 0x11c   :  { %v2837_v21 = vadd.f32 %v2836_v19, %v2767_v18  ;;  %v2838_v22 = vpop.f32.mrb[31].mxu0  ;;  %v2908_v23 = vpop.f32.mrb[31].mxu1 }
 0x11e   :  { %v2907_v24 = vadd.f32 %v2906_v20, %v2837_v21 }
 0x11f   :  { %v2976_v25 = vpop.f32.mrb[32].mxu0  ;;  %v3046_v26 = vpop.f32.mrb[32].mxu1 }
 0x120   :  { %v2977_v27 = vadd.f32 %v2976_v25, %v2907_v24  ;;  %v2978_v28 = vpop.f32.mrb[33].mxu0  ;;  %v3048_v29 = vpop.f32.mrb[33].mxu1 }
 0x122   :  { %v3047_v30 = vadd.f32 %v3046_v26, %v2977_v27 }
 0x123   :  { %v3116_v31 = vpop.f32.mrb[34].mxu0  ;;  %v3186_v32 = vpop.f32.mrb[34].mxu1 }
 0x124   :  { %v3117_v33 = vadd.f32 %v3116_v31, %v3047_v30  ;;  %v3118_v34 = vpop.f32.mrb[35].mxu0  ;;  %v3188_v35 = vpop.f32.mrb[35].mxu1 }
 0x126   :  { %v3187_v36 = vadd.f32 %v3186_v32, %v3117_v33 }
 0x127   :  { %v3256_v37 = vpop.f32.mrb[36].mxu0  ;;  %v3326_v38 = vpop.f32.mrb[36].mxu1 }
 0x128   :  { %v3257_v39 = vadd.f32 %v3256_v37, %v3187_v36  ;;  %v3258_v40 = vpop.f32.mrb[37].mxu0  ;;  %v3328_v41 = vpop.f32.mrb[37].mxu1 }
 0x12a   :  { %v3327_v42 = vadd.f32 %v3326_v38, %v3257_v39 }
 0x12b   :  { %v3396_v43 = vpop.f32.mrb[38].mxu0  ;;  %v3466_v44 = vpop.f32.mrb[38].mxu1 }
 0x12c   :  { %v3397_v45 = vadd.f32 %v3396_v43, %v3327_v42  ;;  %v3398_v46 = vpop.f32.mrb[39].mxu0  ;;  %v3468_v47 = vpop.f32.mrb[39].mxu1 }
 0x12e   :  { %v3467_v48 = vadd.f32 %v3466_v44, %v3397_v45 }
 0x12f   :  { %v3536_v49 = vpop.f32.mrb[40].mxu0  ;;  %v3606_v50 = vpop.f32.mrb[40].mxu1 }
 0x130   :  { %v3537_v51 = vadd.f32 %v3536_v49, %v3467_v48  ;;  %v3538_v52 = vpop.f32.mrb[41].mxu0  ;;  %v3608_v16 = vpop.f32.mrb[41].mxu1 }
 0x132   :  { %v3607_v53 = vadd.f32 %v3606_v50, %v3537_v51 }
 0x133   :  { %v3676_v54 = vpop.f32.mrb[42].mxu0  ;;  %v3746_v55 = vpop.f32.mrb[42].mxu1 }
 0x134   :  { %v3677_v56 = vadd.f32 %v3676_v54, %v3607_v53  ;;  %v3678_v57 = vpop.f32.mrb[43].mxu0  ;;  %v3748_v58 = vpop.f32.mrb[43].mxu1 }
 0x136   :  { %v3747_v59 = vadd.f32 %v3746_v55, %v3677_v56 }
 0x137   :  { %v3816_v60 = vpop.f32.mrb[44].mxu0  ;;  %v3886_v61 = vpop.f32.mrb[44].mxu1 }
 0x138   :  { %v3817_v62 = vadd.f32 %v3816_v60, %v3747_v59  ;;  %v3818_v63 = vpop.f32.mrb[45].mxu0  ;;  %v3888_v0 = vpop.f32.mrb[45].mxu1 }
 0x13a   :  { %v3887_v1 = vadd.f32 %v3886_v61, %v3817_v62 }
 0x13b   :  { %v3956_v2 = vpop.f32.mrb[46].mxu0  ;;  %v4026_v3 = vpop.f32.mrb[46].mxu1 }
 0x13c   :  { %v3957_v4 = vadd.f32 %v3956_v2, %v3887_v1  ;;  %v3958_v5 = vpop.f32.mrb[47].mxu0  ;;  %v4028_v6 = vpop.f32.mrb[47].mxu1 }
 0x13e   :  { %v4027_v8 = vadd.f32 %v4026_v3, %v3957_v4 }
 0x140   :  { %v4030_v9 = vadd.f32 %v4027_v8, %v21_v7 }
 0x142   :  { %4032 = vst.msk [vmem:[#allocation2] sm:$0x3] %vm19_vm0, %v4030_v9 }
 0x149   :  { %v4036_v11 = vld [vmem:[#allocation2] sm:$0x3] }
 0x14a   :  { %v4044_v12 = vadd.f32 %v4060_v10, %v4036_v11 }
 0x14c   :  { %4045 = vst.msk [vmem:[#allocation3] sm:$0x3] %vm19_vm0, %v4044_v12 }
 0x14d   :  { %4099 = shalt.err (!%p4096_p4)
}
 0x14e   :  { %s4100_s14 = scalar_lea.hbm %s4566_s3, 32 }
 0x14f   :  { %p4101_p5 = scmp.ne.s32.totalorder %s4566_s3, %s4100_s14  ;;  %p4104_p6 = scmp.lt.u32.totalorder %s4100_s14, %s4566_s3 }
 0x151   :  { %p4106_p7 = pnand %p4104_p6, %p4101_p5 }
 0x153   :  { %4109 = shalt.err (!%p4106_p7)
}
 0x154   :  { %4055 = dma.vmem_to_hbm [thread:$0]  %s4053_s10, 32, %s4566_s3, [#allocation4]  }
 0x155   :  { %4110 = dma.done.wait [#allocation4], 32  }
 0x156   :  { %4111 = vsyncadd [#allocation4], 4294967264 }
 0x157   :  { %4059 = vsyncpa [#allocation4], 1 }

</bundles_post_ra>
